<compile_context>
chip_gen: v5e
topology: v5e:2x2
jax: 0.10.0
libtpu: 0.0.40
codegen_flags: <defaults>
</compile_context>

<pallas_src>
from functools import partial

import jax
import jax.numpy as jnp
from jax.experimental import pallas as pl
from jax.experimental.pallas import tpu as pltpu


# ----------------------------------------------------------------------------
# Fused decoder kernel: one grid step == one decode time step.
# inputs : tok (1,B,1) i32, enc (B,2E), projW^T (2E,E), projb (1,E),
#          W_ih^T (E,3E), W_hh^T (E,3E), b_ih (1,3E), b_hh (1,3E),
#          C (V,E), mem (B,M,E), gp (B,M)
# outputs: vocab logits slab (1,B,V), pointer logits slab (1,B,M)
# scratch: h (B,E) f32  -- persists across grid steps
# ----------------------------------------------------------------------------
def _fused_decoder_kernel(tok_ref, enc_ref, pw_ref, pb_ref,
                          wih_ref, whh_ref, bih_ref, bhh_ref,
                          c_ref, mem_ref, gp_ref,
                          vocab_ref, ptr_ref,
                          h_ref):
    t = pl.program_id(0)
    E = h_ref.shape[1]
    B = vocab_ref.shape[1]
    V = vocab_ref.shape[2]

    # hidden = relu(projector(encode_hidden)); folded into the first step.
    @pl.when(t == 0)
    def _():
        h0 = jnp.dot(enc_ref[...], pw_ref[...],
                     preferred_element_type=jnp.float32)
        h_ref[...] = jnp.maximum(h0 + pb_ref[...], 0.0)

    h = h_ref[...]

    # Embedding lookup as one-hot(token) @ C on the MXU (dropout = identity).
    tok = tok_ref[0]                                            # (B, 1) int32
    onehot = (jax.lax.broadcasted_iota(jnp.int32, (B, V), 1)
              == tok).astype(jnp.float32)                       # (B, V)
    embed_q = jnp.dot(onehot, c_ref[...],
                      preferred_element_type=jnp.float32)       # (B, E)

    # GRU cell (matches torch.nn.GRU gate math; b_hh applied inside gh).
    gi = jnp.dot(embed_q, wih_ref[...],
                 preferred_element_type=jnp.float32) + bih_ref[...]
    gh = jnp.dot(h, whh_ref[...],
                 preferred_element_type=jnp.float32) + bhh_ref[...]
    i_r, i_z, i_n = gi[:, :E], gi[:, E:2 * E], gi[:, 2 * E:]
    h_r, h_z, h_n = gh[:, :E], gh[:, E:2 * E], gh[:, 2 * E:]
    r = jax.nn.sigmoid(i_r + h_r)
    z = jax.nn.sigmoid(i_z + h_z)
    n = jnp.tanh(i_n + r * h_n)
    h_new = (1.0 - z) * n + z * h
    h_ref[...] = h_new

    # attend_vocab: h_new @ C^T, contracting C's E axis in place (no
    # transposed copy of C is ever materialized).
    vocab_ref[0] = jax.lax.dot_general(
        h_new, c_ref[...], (((1,), (1,)), ((), ())),
        preferred_element_type=jnp.float32)                     # (B, V)

    # extKnow pointer logits: contract over E, then gate by the global
    # pointer (== gating mem before the dot, without the (B,M,E) gated copy).
    scores = jnp.sum(mem_ref[...] * h_new[:, None, :], axis=-1)  # (B, M)
    ptr_ref[0] = gp_ref[...] * scores


def _build_decoder_call(T, B, E, V, M):
    grid_spec = pltpu.PrefetchScalarGridSpec(
        num_scalar_prefetch=0,
        grid=(T,),
        in_specs=[
            pl.BlockSpec((1, B, 1), lambda t: (t, 0, 0)),       # token ids
            pl.BlockSpec((B, 2 * E), lambda t: (0, 0)),         # encode_hidden
            pl.BlockSpec((2 * E, E), lambda t: (0, 0)),         # proj W^T
            pl.BlockSpec((1, E), lambda t: (0, 0)),             # proj b
            pl.BlockSpec((E, 3 * E), lambda t: (0, 0)),         # W_ih^T
            pl.BlockSpec((E, 3 * E), lambda t: (0, 0)),         # W_hh^T
            pl.BlockSpec((1, 3 * E), lambda t: (0, 0)),         # b_ih
            pl.BlockSpec((1, 3 * E), lambda t: (0, 0)),         # b_hh
            pl.BlockSpec((V, E), lambda t: (0, 0)),             # shared emb C
            pl.BlockSpec((B, M, E), lambda t: (0, 0, 0)),       # ext memory
            pl.BlockSpec((B, M), lambda t: (0, 0)),             # global ptr
        ],
        out_specs=[
            pl.BlockSpec((1, B, V), lambda t: (t, 0, 0)),
            pl.BlockSpec((1, B, M), lambda t: (t, 0, 0)),
        ],
        scratch_shapes=[pltpu.VMEM((B, E), jnp.float32)],
    )
    return pl.pallas_call(
        _fused_decoder_kernel,
        out_shape=(jax.ShapeDtypeStruct((T, B, V), jnp.float32),
                   jax.ShapeDtypeStruct((T, B, M), jnp.float32)),
        grid_spec=grid_spec,
        compiler_params=pltpu.CompilerParams(
            dimension_semantics=("arbitrary",),     # T carries hidden state
            vmem_limit_bytes=48 * 1024 * 1024,
        ),
    )


# ----------------------------------------------------------------------------
# Full LocalMemoryDecoder.forward (teacher forcing), jitted.
# ----------------------------------------------------------------------------
@partial(jax.jit, static_argnames=("max_target_length", "sos_token"))
def local_memory_decoder_forward(params, encode_hidden, target_batches,
                                 mem_embed, global_pointer,
                                 max_target_length, sos_token):
    """Returns (all_decoder_outputs_vocab [T,B,V],
                all_decoder_outputs_ptr   [T,B,M])."""
    C = params["C"]                                   # (V, E) shared embedding
    V, E = C.shape
    B = encode_hidden.shape[0]
    M = mem_embed.shape[1]
    T = max_target_length

    # Teacher forcing: input token at step 0 is SOS, at step t it is
    # target_batches[:, t-1].
    tok0 = jnp.full((1, B), sos_token, dtype=jnp.int32)
    toks = jnp.concatenate(
        [tok0, target_batches[:, :T - 1].astype(jnp.int32).T], axis=0)
    toks = toks.reshape(T, B, 1)

    call = _build_decoder_call(T, B, E, V, M)
    vocab_out, ptr_out = call(
        toks,
        encode_hidden.astype(jnp.float32),
        params["proj_w"].T,                           # constant-folded by jit
        params["proj_b"].reshape(1, E),
        params["gru_w_ih"].T,
        params["gru_w_hh"].T,
        params["gru_b_ih"].reshape(1, 3 * E),
        params["gru_b_hh"].reshape(1, 3 * E),
        C,
        mem_embed.astype(jnp.float32),
        global_pointer.astype(jnp.float32),
    )
    return vocab_out, ptr_out


# ----------------------------------------------------------------------------
# Pure-JAX reference (same math) for a correctness check.
# ----------------------------------------------------------------------------
def _reference_forward(params, encode_hidden, target_batches, mem_embed,
                       global_pointer, T, sos_token):
    with jax.default_matmul_precision("float32"):
        C = params["C"]
        B = encode_hidden.shape[0]
        hidden = jax.nn.relu(
            encode_hidden @ params["proj_w"].T + params["proj_b"])
        dec_in = jnp.full((B,), sos_token, dtype=jnp.int32)
        vocab_outs, ptr_outs = [], []
        for t in range(T):
            x = C[dec_in]
            gi = x @ params["gru_w_ih"].T + params["gru_b_ih"]
            gh = hidden @ params["gru_w_hh"].T + params["gru_b_hh"]
            i_r, i_z, i_n = jnp.split(gi, 3, axis=1)
            h_r, h_z, h_n = jnp.split(gh, 3, axis=1)
            r = jax.nn.sigmoid(i_r + h_r)
            z = jax.nn.sigmoid(i_z + h_z)
            n = jnp.tanh(i_n + r * h_n)
            hidden = (1.0 - z) * n + z * hidden
            vocab_outs.append(hidden @ C.T)
            ptr_outs.append(global_pointer *
                            jnp.einsum("be,bme->bm", hidden, mem_embed))
            dec_in = target_batches[:, t]
        return jnp.stack(vocab_outs, axis=0), jnp.stack(ptr_outs, axis=0)


# ----------------------------------------------------------------------------
# Deterministic parameter construction (shapes from __init__)
# ----------------------------------------------------------------------------
def make_params(key, vocab, emb_dim):
    ks = jax.random.split(key, 8)
    lim_e = 1.0 / jnp.sqrt(jnp.float32(emb_dim))
    lim_p = 1.0 / jnp.sqrt(jnp.float32(2 * emb_dim))
    return {
        # shared_emb C: nn.Embedding(vocab, emb_dim)
        "C": jax.random.normal(ks[0], (vocab, emb_dim), jnp.float32) * 0.1,
        # projector: nn.Linear(2*emb_dim, emb_dim)
        "proj_w": jax.random.uniform(ks[1], (emb_dim, 2 * emb_dim),
                                     jnp.float32, -lim_p, lim_p),
        "proj_b": jax.random.uniform(ks[2], (emb_dim,), jnp.float32,
                                     -lim_p, lim_p),
        # sketch_rnn: nn.GRU(emb_dim, emb_dim)
        "gru_w_ih": jax.random.uniform(ks[3], (3 * emb_dim, emb_dim),
                                       jnp.float32, -lim_e, lim_e),
        "gru_w_hh": jax.random.uniform(ks[4], (3 * emb_dim, emb_dim),
                                       jnp.float32, -lim_e, lim_e),
        "gru_b_ih": jax.random.uniform(ks[5], (3 * emb_dim,), jnp.float32,
                                       -lim_e, lim_e),
        "gru_b_hh": jax.random.uniform(ks[6], (3 * emb_dim,), jnp.float32,
                                       -lim_e, lim_e),
    }


if __name__ == "__main__":
    # Small but vreg-aligned shapes: B multiple of 8 sublanes, E/V/M multiples
    # of 128 lanes (lane-dense stores, lane-aligned GRU gate slices).
    B = 8              # batch_size
    E = 128            # embedding_dim
    V = 256            # lang.n_words
    MEM = 128          # story_size[1]
    T = 6              # max_target_length
    SOS = 2

    key = jax.random.PRNGKey(0)
    k_par, k_enc, k_mem, k_gp, k_tgt = jax.random.split(key, 5)

    params = make_params(k_par, V, E)
    encode_hidden = jax.random.normal(k_enc, (B, 2 * E), jnp.float32)
    mem_embed = jax.random.normal(k_mem, (B, MEM, E), jnp.float32) * 0.1
    global_pointer = jax.nn.sigmoid(
        jax.random.normal(k_gp, (B, MEM), jnp.float32))
    target_batches = jax.random.randint(k_tgt, (B, T), 0, V, dtype=jnp.int32)

    vocab_logits, ptr_logits = local_memory_decoder_forward(
        params, encode_hidden, target_batches, mem_embed, global_pointer,
        max_target_length=T, sos_token=SOS)
    vocab_logits = jax.block_until_ready(vocab_logits)
    ptr_logits = jax.block_until_ready(ptr_logits)

    assert vocab_logits.shape == (T, B, V)
    assert ptr_logits.shape == (T, B, MEM)
    assert jnp.all(jnp.isfinite(vocab_logits))
    assert jnp.all(jnp.isfinite(ptr_logits))

    ref_vocab, ref_ptr = _reference_forward(
        params, encode_hidden, target_batches, mem_embed, global_pointer,
        T, SOS)
    assert jnp.allclose(vocab_logits, ref_vocab, atol=1e-2, rtol=1e-2)
    assert jnp.allclose(ptr_logits, ref_ptr, atol=1e-2, rtol=1e-2)

    print("KERNEL_OK")
</pallas_src>

<mosaic_0001>
module attributes {stable_mosaic.version = 11 : i64} {
  func.func @_fused_decoder_kernel(%arg0: i32, %arg1: memref<1x8x1xi32, #tpu.memory_space<vmem>>, %arg2: memref<8x256xf32, #tpu.memory_space<vmem>>, %arg3: memref<256x128xf32, #tpu.memory_space<vmem>>, %arg4: memref<1x128xf32, #tpu.memory_space<vmem>>, %arg5: memref<128x384xf32, #tpu.memory_space<vmem>>, %arg6: memref<128x384xf32, #tpu.memory_space<vmem>>, %arg7: memref<1x384xf32, #tpu.memory_space<vmem>>, %arg8: memref<1x384xf32, #tpu.memory_space<vmem>>, %arg9: memref<256x128xf32, #tpu.memory_space<vmem>>, %arg10: memref<8x128x128xf32, #tpu.memory_space<vmem>>, %arg11: memref<8x128xf32, #tpu.memory_space<vmem>>, %arg12: memref<1x8x256xf32, #tpu.memory_space<vmem>>, %arg13: memref<1x8x128xf32, #tpu.memory_space<vmem>>, %arg14: memref<8x128xf32, #tpu.memory_space<vmem>>) attributes {dimension_semantics = [#tpu.dimension_semantics<arbitrary>], iteration_bounds = array<i64: 6>, scalar_prefetch = 0 : i64, scratch_operands = 1 : i64, tpu.core_type = #tpu.core_type<tc>, window_params = [{transform_indices = @transform_0, window_bounds = array<i64: 1, 8, 1>}, {pipeline_mode = #tpu.pipeline_mode<synchronous>, transform_indices = @transform_1, window_bounds = array<i64: 8, 256>}, {pipeline_mode = #tpu.pipeline_mode<synchronous>, transform_indices = @transform_2, window_bounds = array<i64: 256, 128>}, {pipeline_mode = #tpu.pipeline_mode<synchronous>, transform_indices = @transform_3, window_bounds = array<i64: 1, 128>}, {pipeline_mode = #tpu.pipeline_mode<synchronous>, transform_indices = @transform_4, window_bounds = array<i64: 128, 384>}, {pipeline_mode = #tpu.pipeline_mode<synchronous>, transform_indices = @transform_5, window_bounds = array<i64: 128, 384>}, {pipeline_mode = #tpu.pipeline_mode<synchronous>, transform_indices = @transform_6, window_bounds = array<i64: 1, 384>}, {pipeline_mode = #tpu.pipeline_mode<synchronous>, transform_indices = @transform_7, window_bounds = array<i64: 1, 384>}, {pipeline_mode = #tpu.pipeline_mode<synchronous>, transform_indices = @transform_8, window_bounds = array<i64: 256, 128>}, {pipeline_mode = #tpu.pipeline_mode<synchronous>, transform_indices = @transform_9, window_bounds = array<i64: 8, 128, 128>}, {pipeline_mode = #tpu.pipeline_mode<synchronous>, transform_indices = @transform_10, window_bounds = array<i64: 8, 128>}, {transform_indices = @transform_11, window_bounds = array<i64: 1, 8, 256>}, {transform_indices = @transform_12, window_bounds = array<i64: 1, 8, 128>}]} {
    %c0_i32 = arith.constant 0 : i32
    %0 = arith.cmpi eq, %arg0, %c0_i32 : i32
    %1 = arith.extui %0 : i1 to i32
    %c0_i32_0 = arith.constant 0 : i32
    %2 = arith.cmpi ne, %1, %c0_i32_0 : i32
    scf.if %2 {
      %c0_37 = arith.constant 0 : index
      %c0_38 = arith.constant 0 : index
      %65 = vector.load %arg2[%c0_37, %c0_38] : memref<8x256xf32, #tpu.memory_space<vmem>>, vector<8x256xf32>
      %c0_39 = arith.constant 0 : index
      %c0_40 = arith.constant 0 : index
      %66 = vector.load %arg3[%c0_39, %c0_40] : memref<256x128xf32, #tpu.memory_space<vmem>>, vector<256x128xf32>
      %cst_41 = arith.constant dense<0.000000e+00> : vector<8x128xf32>
      %67 = tpu.matmul %65, %66, %cst_41 {dimension_numbers = #tpu.dot_dimension_numbers<[1], [0], [0], [1], [0, 0, 1, 1], [], []>} : vector<8x256xf32>, vector<256x128xf32>, vector<8x128xf32> -> vector<8x128xf32>
      %c0_42 = arith.constant 0 : index
      %c0_43 = arith.constant 0 : index
      %68 = vector.load %arg4[%c0_42, %c0_43] : memref<1x128xf32, #tpu.memory_space<vmem>>, vector<1x128xf32>
      %69 = vector.broadcast %68 : vector<1x128xf32> to vector<8x128xf32>
      %70 = arith.addf %67, %69 : vector<8x128xf32>
      %cst_44 = arith.constant 0.000000e+00 : f32
      %71 = vector.broadcast %cst_44 : f32 to vector<8x128xf32>
      %72 = arith.maximumf %70, %71 : vector<8x128xf32>
      %c0_45 = arith.constant 0 : index
      %c0_46 = arith.constant 0 : index
      %73 = vector.load %arg14[%c0_45, %c0_46] : memref<8x128xf32, #tpu.memory_space<vmem>>, vector<8x128xf32>
      tpu.vector_store %arg14[%c0_45, %c0_46], %72 {strides = array<i32>} : memref<8x128xf32, #tpu.memory_space<vmem>>, vector<8x128xf32>,
    } else {
    }
    %c0 = arith.constant 0 : index
    %c0_1 = arith.constant 0 : index
    %3 = vector.load %arg14[%c0, %c0_1] : memref<8x128xf32, #tpu.memory_space<vmem>>, vector<8x128xf32>
    %c0_2 = arith.constant 0 : index
    %c0_3 = arith.constant 0 : index
    %c0_4 = arith.constant 0 : index
    %4 = vector.load %arg1[%c0_2, %c0_3, %c0_4] : memref<1x8x1xi32, #tpu.memory_space<vmem>>, vector<1x8x1xi32>
    %5 = vector.shape_cast %4 : vector<1x8x1xi32> to vector<8x1xi32>
    %6 = tpu.iota {dimensions = array<i32: 1>} : vector<8x256xi32>
    %7 = vector.broadcast %5 : vector<8x1xi32> to vector<8x256xi32>
    %8 = arith.cmpi eq, %6, %7 : vector<8x256xi32>
    %9 = arith.extui %8 : vector<8x256xi1> to vector<8x256xi32>
    %10 = arith.sitofp %9 : vector<8x256xi32> to vector<8x256xf32>
    %c0_5 = arith.constant 0 : index
    %c0_6 = arith.constant 0 : index
    %11 = vector.load %arg9[%c0_5, %c0_6] : memref<256x128xf32, #tpu.memory_space<vmem>>, vector<256x128xf32>
    %cst = arith.constant dense<0.000000e+00> : vector<8x128xf32>
    %12 = tpu.matmul %10, %11, %cst {dimension_numbers = #tpu.dot_dimension_numbers<[1], [0], [0], [1], [0, 0, 1, 1], [], []>} : vector<8x256xf32>, vector<256x128xf32>, vector<8x128xf32> -> vector<8x128xf32>
    %c0_7 = arith.constant 0 : index
    %c0_8 = arith.constant 0 : index
    %13 = vector.load %arg5[%c0_7, %c0_8] : memref<128x384xf32, #tpu.memory_space<vmem>>, vector<128x384xf32>
    %cst_9 = arith.constant dense<0.000000e+00> : vector<8x384xf32>
    %14 = tpu.matmul %12, %13, %cst_9 {dimension_numbers = #tpu.dot_dimension_numbers<[1], [0], [0], [1], [0, 0, 1, 1], [], []>} : vector<8x128xf32>, vector<128x384xf32>, vector<8x384xf32> -> vector<8x384xf32>
    %c0_10 = arith.constant 0 : index
    %c0_11 = arith.constant 0 : index
    %15 = vector.load %arg7[%c0_10, %c0_11] : memref<1x384xf32, #tpu.memory_space<vmem>>, vector<1x384xf32>
    %16 = vector.broadcast %15 : vector<1x384xf32> to vector<8x384xf32>
    %17 = arith.addf %14, %16 : vector<8x384xf32>
    %c0_12 = arith.constant 0 : index
    %c0_13 = arith.constant 0 : index
    %18 = vector.load %arg6[%c0_12, %c0_13] : memref<128x384xf32, #tpu.memory_space<vmem>>, vector<128x384xf32>
    %cst_14 = arith.constant dense<0.000000e+00> : vector<8x384xf32>
    %19 = tpu.matmul %3, %18, %cst_14 {dimension_numbers = #tpu.dot_dimension_numbers<[1], [0], [0], [1], [0, 0, 1, 1], [], []>} : vector<8x128xf32>, vector<128x384xf32>, vector<8x384xf32> -> vector<8x384xf32>
    %c0_15 = arith.constant 0 : index
    %c0_16 = arith.constant 0 : index
    %20 = vector.load %arg8[%c0_15, %c0_16] : memref<1x384xf32, #tpu.memory_space<vmem>>, vector<1x384xf32>
    %21 = vector.broadcast %20 : vector<1x384xf32> to vector<8x384xf32>
    %22 = arith.addf %19, %21 : vector<8x384xf32>
    %23 = vector.extract_strided_slice %17 {offsets = [0, 0], sizes = [8, 128], strides = [1, 1]} : vector<8x384xf32> to vector<8x128xf32>
    %24 = vector.extract_strided_slice %17 {offsets = [0, 128], sizes = [8, 128], strides = [1, 1]} : vector<8x384xf32> to vector<8x128xf32>
    %25 = vector.extract_strided_slice %17 {offsets = [0, 256], sizes = [8, 128], strides = [1, 1]} : vector<8x384xf32> to vector<8x128xf32>
    %26 = vector.extract_strided_slice %22 {offsets = [0, 0], sizes = [8, 128], strides = [1, 1]} : vector<8x384xf32> to vector<8x128xf32>
    %27 = vector.extract_strided_slice %22 {offsets = [0, 128], sizes = [8, 128], strides = [1, 1]} : vector<8x384xf32> to vector<8x128xf32>
    %28 = vector.extract_strided_slice %22 {offsets = [0, 256], sizes = [8, 128], strides = [1, 1]} : vector<8x384xf32> to vector<8x128xf32>
    %29 = arith.addf %23, %26 : vector<8x128xf32>
    %30 = arith.negf %29 : vector<8x128xf32>
    %31 = math.exp %30 : vector<8x128xf32>
    %cst_17 = arith.constant 1.000000e+00 : f32
    %32 = vector.broadcast %cst_17 : f32 to vector<8x128xf32>
    %33 = arith.addf %32, %31 : vector<8x128xf32>
    %34 = arith.divf %32, %33 : vector<8x128xf32>
    %35 = arith.addf %24, %27 : vector<8x128xf32>
    %36 = arith.negf %35 : vector<8x128xf32>
    %37 = math.exp %36 : vector<8x128xf32>
    %cst_18 = arith.constant 1.000000e+00 : f32
    %38 = vector.broadcast %cst_18 : f32 to vector<8x128xf32>
    %39 = arith.addf %38, %37 : vector<8x128xf32>
    %40 = arith.divf %38, %39 : vector<8x128xf32>
    %41 = arith.mulf %34, %28 : vector<8x128xf32>
    %42 = arith.addf %25, %41 : vector<8x128xf32>
    %43 = math.tanh %42 : vector<8x128xf32>
    %cst_19 = arith.constant 1.000000e+00 : f32
    %44 = vector.broadcast %cst_19 : f32 to vector<8x128xf32>
    %45 = arith.subf %44, %40 : vector<8x128xf32>
    %46 = arith.mulf %45, %43 : vector<8x128xf32>
    %47 = arith.mulf %40, %3 : vector<8x128xf32>
    %48 = arith.addf %46, %47 : vector<8x128xf32>
    %c0_20 = arith.constant 0 : index
    %c0_21 = arith.constant 0 : index
    %49 = vector.load %arg14[%c0_20, %c0_21] : memref<8x128xf32, #tpu.memory_space<vmem>>, vector<8x128xf32>
    tpu.vector_store %arg14[%c0_20, %c0_21], %48 {strides = array<i32>} : memref<8x128xf32, #tpu.memory_space<vmem>>, vector<8x128xf32>,
    %c0_22 = arith.constant 0 : index
    %c0_23 = arith.constant 0 : index
    %50 = vector.load %arg9[%c0_22, %c0_23] : memref<256x128xf32, #tpu.memory_space<vmem>>, vector<256x128xf32>
    %cst_24 = arith.constant dense<0.000000e+00> : vector<8x256xf32>
    %51 = tpu.matmul %48, %50, %cst_24 {dimension_numbers = #tpu.dot_dimension_numbers<[1], [1], [0], [0], [0, 0, 1, 0], [], []>} : vector<8x128xf32>, vector<256x128xf32>, vector<8x256xf32> -> vector<8x256xf32>
    %c0_25 = arith.constant 0 : index
    %c0_26 = arith.constant 0 : index
    %c0_27 = arith.constant 0 : index
    %52 = vector.load %arg12[%c0_25, %c0_26, %c0_27] : memref<1x8x256xf32, #tpu.memory_space<vmem>>, vector<1x8x256xf32>
    %53 = vector.shape_cast %52 : vector<1x8x256xf32> to vector<8x256xf32>
    %54 = vector.shape_cast %51 : vector<8x256xf32> to vector<1x8x256xf32>
    tpu.vector_store %arg12[%c0_25, %c0_26, %c0_27], %54 {strides = array<i32>} : memref<1x8x256xf32, #tpu.memory_space<vmem>>, vector<1x8x256xf32>,
    %c0_28 = arith.constant 0 : index
    %c0_29 = arith.constant 0 : index
    %c0_30 = arith.constant 0 : index
    %55 = vector.load %arg10[%c0_28, %c0_29, %c0_30] : memref<8x128x128xf32, #tpu.memory_space<vmem>>, vector<8x128x128xf32>
    %56 = vector.shape_cast %48 : vector<8x128xf32> to vector<8x1x128xf32>
    %57 = vector.broadcast %56 : vector<8x1x128xf32> to vector<8x128x128xf32>
    %58 = arith.mulf %55, %57 : vector<8x128x128xf32>
    %cst_31 = arith.constant dense<0.000000e+00> : vector<8x128xf32>
    %59 = vector.multi_reduction <add>, %58, %cst_31 [2] : vector<8x128x128xf32> to vector<8x128xf32>
    %c0_32 = arith.constant 0 : index
    %c0_33 = arith.constant 0 : index
    %60 = vector.load %arg11[%c0_32, %c0_33] : memref<8x128xf32, #tpu.memory_space<vmem>>, vector<8x128xf32>
    %61 = arith.mulf %60, %59 : vector<8x128xf32>
    %c0_34 = arith.constant 0 : index
    %c0_35 = arith.constant 0 : index
    %c0_36 = arith.constant 0 : index
    %62 = vector.load %arg13[%c0_34, %c0_35, %c0_36] : memref<1x8x128xf32, #tpu.memory_space<vmem>>, vector<1x8x128xf32>
    %63 = vector.shape_cast %62 : vector<1x8x128xf32> to vector<8x128xf32>
    %64 = vector.shape_cast %61 : vector<8x128xf32> to vector<1x8x128xf32>
    tpu.vector_store %arg13[%c0_34, %c0_35, %c0_36], %64 {strides = array<i32>} : memref<1x8x128xf32, #tpu.memory_space<vmem>>, vector<1x8x128xf32>,
    return
  }
  func.func @transform_0(%arg0: i32) -> (i32, i32, i32) {
    %c0_i32 = arith.constant 0 : i32
    %c0_i32_0 = arith.constant 0 : i32
    %c0_i32_1 = arith.constant 0 : i32
    return %arg0, %c0_i32, %c0_i32_0 : i32, i32, i32
  }
  func.func @transform_1(%arg0: i32) -> (i32, i32) {
    %c0_i32 = arith.constant 0 : i32
    %c0_i32_0 = arith.constant 0 : i32
    %c0_i32_1 = arith.constant 0 : i32
    return %c0_i32, %c0_i32_0 : i32, i32
  }
  func.func @transform_2(%arg0: i32) -> (i32, i32) {
    %c0_i32 = arith.constant 0 : i32
    %c0_i32_0 = arith.constant 0 : i32
    %c0_i32_1 = arith.constant 0 : i32
    return %c0_i32, %c0_i32_0 : i32, i32
  }
  func.func @transform_3(%arg0: i32) -> (i32, i32) {
    %c0_i32 = arith.constant 0 : i32
    %c0_i32_0 = arith.constant 0 : i32
    %c0_i32_1 = arith.constant 0 : i32
    return %c0_i32, %c0_i32_0 : i32, i32
  }
  func.func @transform_4(%arg0: i32) -> (i32, i32) {
    %c0_i32 = arith.constant 0 : i32
    %c0_i32_0 = arith.constant 0 : i32
    %c0_i32_1 = arith.constant 0 : i32
    return %c0_i32, %c0_i32_0 : i32, i32
  }
  func.func @transform_5(%arg0: i32) -> (i32, i32) {
    %c0_i32 = arith.constant 0 : i32
    %c0_i32_0 = arith.constant 0 : i32
    %c0_i32_1 = arith.constant 0 : i32
    return %c0_i32, %c0_i32_0 : i32, i32
  }
  func.func @transform_6(%arg0: i32) -> (i32, i32) {
    %c0_i32 = arith.constant 0 : i32
    %c0_i32_0 = arith.constant 0 : i32
    %c0_i32_1 = arith.constant 0 : i32
    return %c0_i32, %c0_i32_0 : i32, i32
  }
  func.func @transform_7(%arg0: i32) -> (i32, i32) {
    %c0_i32 = arith.constant 0 : i32
    %c0_i32_0 = arith.constant 0 : i32
    %c0_i32_1 = arith.constant 0 : i32
    return %c0_i32, %c0_i32_0 : i32, i32
  }
  func.func @transform_8(%arg0: i32) -> (i32, i32) {
    %c0_i32 = arith.constant 0 : i32
    %c0_i32_0 = arith.constant 0 : i32
    %c0_i32_1 = arith.constant 0 : i32
    return %c0_i32, %c0_i32_0 : i32, i32
  }
  func.func @transform_9(%arg0: i32) -> (i32, i32, i32) {
    %c0_i32 = arith.constant 0 : i32
    %c0_i32_0 = arith.constant 0 : i32
    %c0_i32_1 = arith.constant 0 : i32
    %c0_i32_2 = arith.constant 0 : i32
    return %c0_i32, %c0_i32_0, %c0_i32_1 : i32, i32, i32
  }
  func.func @transform_10(%arg0: i32) -> (i32, i32) {
    %c0_i32 = arith.constant 0 : i32
    %c0_i32_0 = arith.constant 0 : i32
    %c0_i32_1 = arith.constant 0 : i32
    return %c0_i32, %c0_i32_0 : i32, i32
  }
  func.func @transform_11(%arg0: i32) -> (i32, i32, i32) {
    %c0_i32 = arith.constant 0 : i32
    %c0_i32_0 = arith.constant 0 : i32
    %c0_i32_1 = arith.constant 0 : i32
    return %arg0, %c0_i32, %c0_i32_0 : i32, i32, i32
  }
  func.func @transform_12(%arg0: i32) -> (i32, i32, i32) {
    %c0_i32 = arith.constant 0 : i32
    %c0_i32_0 = arith.constant 0 : i32
    %c0_i32_1 = arith.constant 0 : i32
    return %arg0, %c0_i32, %c0_i32_0 : i32, i32, i32
  }
}

</mosaic_0001>

<bundles_post_ra>
// kernel: local_memory_decoder_forward.1
= control target key start
LH: loop header
LB: loop body
LE: loop exit
PB: predicated region body
PF: predicated region fallthrough
CT: control target
= control target key end

     0   :  { %18 = vsyncpa [#allocation4], 0  ;;  %s3935_s0 = inlined_call_operand.vmem [shape: s32[6,8,1], index: 0, kind: input, shape index: {}]   ;;  %s3936_s1 = inlined_call_operand.vmem [shape: f32[8,256], index: 1, kind: input, shape index: {}]   ;;  %s3937_s2 = inlined_call_operand.vmem [shape: f32[256,128], index: 2, kind: input, shape index: {}]   ;;  %s3938_s3 = inlined_call_operand.vmem [shape: f32[1,128], index: 3, kind: input, shape index: {}]   ;;  %s3939_s4 = inlined_call_operand.vmem [shape: f32[128,384], index: 4, kind: input, shape index: {}]   ;;  %s3940_s5 = inlined_call_operand.vmem [shape: f32[128,384], index: 5, kind: input, shape index: {}]   ;;  %s3941_s6 = inlined_call_operand.vmem [shape: f32[1,384], index: 6, kind: input, shape index: {}]   ;;  %s3942_s7 = inlined_call_operand.vmem [shape: f32[1,384], index: 7, kind: input, shape index: {}]   ;;  %s3943_s8 = inlined_call_operand.vmem [shape: f32[256,128], index: 8, kind: input, shape index: {}]   ;;  %s3944_s9 = inlined_call_operand.vmem [shape: f32[8,128,128], index: 9, kind: input, shape index: {}]   ;;  %s3945_s10 = inlined_call_operand.vmem [shape: f32[8,128], index: 10, kind: input, shape index: {}]   ;;  %s3946_s11 = inlined_call_operand.hbm [shape: f32[6,8,256], index: 11, kind: output, shape index: {0}]   ;;  %s3947_s12 = inlined_call_operand.hbm [shape: f32[6,8,128], index: 12, kind: output, shape index: {1}]  }
   0x1   :  { %20 = vsyncpa [#allocation4 + $0x1], 0 }
   0x2   :  { %21 = vsyncpa [#allocation6], 0 }
   0x3   :  { %23 = vsyncpa [#allocation6 + $0x1], 0  ;;  %s2275_s21 = smov 0   ;;  %s2277_s22 = smov 0  }
   0x4   :  { %s2279_s23 = smov 0   ;;  %s2281_s24 = smov 0  }
   0x5 LB: > { %3954 = sst [smem:[#allocation9_spill]] %s2194_s21  ;;  %s2296_s25 = sadd.s32 4294967295, %s2206_s24   ;;  %s2206_s24 = sphi %s2281_s24, %s3964_s24   ;;  %s2202_s23 = sphi %s2279_s23, %s3967_s23   ;;  %s2198_s22 = sphi %s2277_s22, %s3966_s22   ;;  %s2194_s21 = sphi %s2275_s21, %s3965_s21  }
   0x6   : > { %3955 = sst [smem:[#allocation10_spill]] %s2198_s22  ;;  %s2032_s26 = sadd.s32 4294967294, %s2206_s24  }
   0x7   : > { %3956 = sst [smem:[#allocation11_spill]] %s2202_s23  ;;  %s2300_s27 = sadd.s32 1, %s2206_s24  }
   0x8   : > { %3957 = sst [smem:[#allocation12_spill]] %s2300_s27  ;;  %s272_s28 = sadd.s32 1, %s2202_s23 }
   0x9   : > { %s269_s29 = ssub.s32 %s2206_s24, %s2300_s27  ;;  %p282_p0 = scmp.ne.s32.totalorder %s2202_s23, %s2198_s22 }
   0xa   : > { %p270_p1 = scmp.eq.s32.totalorder %s269_s29, 0  ;;  %p283_p2 = scmp.eq.s32.totalorder %s2296_s25, 5 }
   0xb   : > { %p288_p3 = scmp.ne.s32.totalorder %s2198_s22, %s2194_s21  ;;  %p289_p4 = scmp.eq.s32.totalorder %s2032_s26, 5 }
   0xc   : > { %s2311_s30 = scalar_select %p270_p1, %s2202_s23, %s272_s28  }
   0xd   : > { %p2313_p5 = por %p283_p2, %p282_p0  ;;  %p2317_p6 = por %p289_p4, %p288_p3 }
   0xe   : > { %3958 = sst [smem:[#allocation13_spill]] %s2311_s30  ;;  %p2035_p7 = scmp.ge.s32.totalorder %s2206_s24, 1 }
   0xf   : > { %s3960_s14 = scalar_select %p2317_p6, 1, 0 }
  0x10   : > { %p370_p8 = scmp.lt.s32.totalorder %s2206_s24, 7 }
  0x11   : > { %3961 = sst [smem:[#allocation14_spill]] %s3960_s14 }
  0x12   : > { %p371_p9 = pnand %p2035_p7, %p370_p8 }
  0x13   : > { %s2324_s15 = sand.u32 (!%p371_p9), 1, %s2198_s22   ;;  %p416_p10 = scmp.lt.s32.totalorder (!%p371_p9), %s2296_s25, 5 }
  0x14   : > { %374 = sbr.rel (%p371_p9) target bundleno = 1110 (0x456), region = 64  ;;  %s2036_s16 = sshll.u32 (!%p371_p9), %s2324_s15, 4 }
  0x15   : > { %s2037_s17 = sshll.u32 (!%p371_p9), %s2324_s15, 3  ;;  %s2335_s29 = scalar_lea.vmem (!%p371_p9), [#allocation3], %s2036_s16 }
  0x16   : > { %s2337_s30 = scalar_lea.vmem (!%p371_p9), [#allocation5], %s2037_s17  ;;  %p2039_p11 = scmp.ne.s32.totalorder (!%p371_p9), %s2296_s25, 0 }
  0x19   : > { %s417_s18 = scalar_select %p416_p10, %s2296_s25, 5 }
  0x1a   : > { %423 = sbr.rel (%p2039_p11) target bundleno = 196 (0xc4), region = 68 }
  0x1b   : > { %s2038_s19 = sshll.u32 %s417_s18, 3 }
  0x1c   : > { %s2333_s28 = scalar_lea.vmem %s3935_s0, %s2038_s19 }
  0x1f   : > { %v441_v0 = vld [vmem:[%s3937_s2 + $0x78] sm:$0xff]  ;;  %v440_v1 = vld [vmem:[%s3937_s2 + $0x70] sm:$0xff]  ;;  %v439_v4 = vld [vmem:[%s3937_s2 + $0x68] sm:$0xff] }
  0x20   : > { %v457_v2 = vld [vmem:[%s3937_s2 + $0xf8] sm:$0xff]  ;;  %462 = vmatpush.msra.mxu0 %v441_v0  ;;  %v456_v3 = vld [vmem:[%s3937_s2 + $0xf0] sm:$0xff]  ;;  %v455_v5 = vld [vmem:[%s3937_s2 + $0xe8] sm:$0xff] }
  0x21   : > { %482 = vmatpush.msra.mxu1 %v457_v2  ;;  %v438_v6 = vld [vmem:[%s3937_s2 + $0x60] sm:$0xff]  ;;  %v437_v8 = vld [vmem:[%s3937_s2 + $0x58] sm:$0xff]  ;;  %v436_v10 = vld [vmem:[%s3937_s2 + $0x50] sm:$0xff] }
  0x22   : > { %463 = vmatpush.msra.mxu0 %v440_v1  ;;  %v454_v7 = vld [vmem:[%s3937_s2 + $0xe0] sm:$0xff]  ;;  %v453_v9 = vld [vmem:[%s3937_s2 + $0xd8] sm:$0xff]  ;;  %v452_v11 = vld [vmem:[%s3937_s2 + $0xd0] sm:$0xff] }
  0x23   : > { %483 = vmatpush.msra.mxu1 %v456_v3  ;;  %v435_v12 = vld [vmem:[%s3937_s2 + $0x48] sm:$0xff]  ;;  %v434_v14 = vld [vmem:[%s3937_s2 + $0x40] sm:$0xff]  ;;  %v433_v16 = vld [vmem:[%s3937_s2 + $0x38] sm:$0xff] }
  0x24   : > { %464 = vmatpush.msra.mxu0 %v439_v4  ;;  %v451_v13 = vld [vmem:[%s3937_s2 + $0xc8] sm:$0xff]  ;;  %v450_v15 = vld [vmem:[%s3937_s2 + $0xc0] sm:$0xff]  ;;  %v449_v17 = vld [vmem:[%s3937_s2 + $0xb8] sm:$0xff] }
  0x25   : > { %484 = vmatpush.msra.mxu1 %v455_v5  ;;  %v432_v18 = vld [vmem:[%s3937_s2 + $0x30] sm:$0xff]  ;;  %v431_v20 = vld [vmem:[%s3937_s2 + $0x28] sm:$0xff]  ;;  %v430_v22 = vld [vmem:[%s3937_s2 + $0x20] sm:$0xff] }
  0x26   : > { %465 = vmatpush.msra.mxu0 %v438_v6  ;;  %v448_v19 = vld [vmem:[%s3937_s2 + $0xb0] sm:$0xff]  ;;  %v447_v21 = vld [vmem:[%s3937_s2 + $0xa8] sm:$0xff]  ;;  %v446_v23 = vld [vmem:[%s3937_s2 + $0xa0] sm:$0xff] }
  0x27   : > { %485 = vmatpush.msra.mxu1 %v454_v7  ;;  %v429_v24 = vld [vmem:[%s3937_s2 + $0x18] sm:$0xff]  ;;  %v428_v26 = vld [vmem:[%s3937_s2 + $0x10] sm:$0xff]  ;;  %v427_v28 = vld [vmem:[%s3937_s2 + $0x8] sm:$0xff] }
  0x28   : > { %466 = vmatpush.msra.mxu0 %v437_v8  ;;  %v445_v25 = vld [vmem:[%s3937_s2 + $0x98] sm:$0xff]  ;;  %v444_v27 = vld [vmem:[%s3937_s2 + $0x90] sm:$0xff]  ;;  %v443_v29 = vld [vmem:[%s3937_s2 + $0x88] sm:$0xff] }
  0x29   : > { %486 = vmatpush.msra.mxu1 %v453_v9  ;;  %v426_v30 = vld [vmem:[%s3937_s2] sm:$0xff]  ;;  %v425_v33 = vld [vmem:[%s3936_s1 + $0x8] sm:$0xff] }
  0x2a   : > { %467 = vmatpush.msra.mxu0 %v436_v10  ;;  %v442_v31 = vld [vmem:[%s3937_s2 + $0x80] sm:$0xff] }
  0x2b   : > { %487 = vmatpush.msra.mxu1 %v452_v11  ;;  %v424_v32 = vld [vmem:[%s3936_s1] sm:$0xff] }
  0x2c   : > { %468 = vmatpush.msra.mxu0 %v435_v12  ;;  %v2100_v34 = vld [vmem:[%s3938_s3] ss:$0 sm:$0xff] }
  0x2d   : > { %488 = vmatpush.msra.mxu1 %v451_v13 }
  0x2e   : > { %469 = vmatpush.msra.mxu0 %v434_v14 }
  0x2f   : > { %489 = vmatpush.msra.mxu1 %v450_v15 }
  0x30   : > { %470 = vmatpush.msra.mxu0 %v433_v16 }
  0x31   : > { %490 = vmatpush.msra.mxu1 %v449_v17 }
  0x32   : > { %471 = vmatpush.msra.mxu0 %v432_v18 }
  0x33   : > { %491 = vmatpush.msra.mxu1 %v448_v19 }
  0x34   : > { %472 = vmatpush.msra.mxu0 %v431_v20 }
  0x35   : > { %492 = vmatpush.msra.mxu1 %v447_v21 }
  0x36   : > { %473 = vmatpush.msra.mxu0 %v430_v22 }
  0x37   : > { %493 = vmatpush.msra.mxu1 %v446_v23 }
  0x38   : > { %474 = vmatpush.msra.mxu0 %v429_v24 }
  0x39   : > { %494 = vmatpush.msra.mxu1 %v445_v25 }
  0x3a   : > { %475 = vmatpush.msra.mxu0 %v428_v26 }
  0x3b   : > { %495 = vmatpush.msra.mxu1 %v444_v27 }
  0x3c   : > { %476 = vmatpush.msra.mxu0 %v427_v28 }
  0x3d   : > { %496 = vmatpush.msra.mxu1 %v443_v29 }
  0x3e   : > { %477 = vmatpush.msra.mxu0 %v426_v30 }
  0x3f   : > { %497 = vmatpush.msra.mxu1 %v442_v31  ;;  %478 = vmatmul.f32.vlgmr.msra.gmra.mxu0 %v424_v32 }
  0x40   : > { %498 = vmatmul.f32.vlgmr.msra.gmra.mxu1 %v425_v33 }
  0xbc   : > { %v479_v35 = vpop.f32.mrf.mxu0 }
  0xbd   : > { %v499_v36 = vpop.f32.mrf.mxu1  ;;  %v480_v37 = vadd.f32 %v2100_v34, %v479_v35 }
  0xbf   : > { %v500_v38 = vadd.f32 %v499_v36, %v480_v37 }
  0xc1   : > { %v502_v39 = vmax.f32 %v500_v38, 0.0 }
  0xc3   : > { %503 = vst [vmem:[#allocation2] sm:$0xff] %v502_v39 }
  0xc4 PF: > { %v505_v40 = vld [vmem:[%s2333_s28] sm:$0xff]  ;;  %v2449_v41 = vld [vmem:[%s3943_s8 + $0x78] sm:$0xff]  ;;  %v2208_v43 = vmov 0   ;;  %v2460_v44 = vld [vmem:[%s3943_s8 + $0x70] sm:$0xff]  ;;  %vm1612_vm10 = vcmask 130112   ;;  %vm1616_vm11 = vcmask 195712  }
  0xc5   : > { %v2454_v42 = vld [vmem:[%s3943_s8 + $0xf8] sm:$0xff]  ;;  %2101 = vset.pattern.permute.xlu0 %v2208_v43  ;;  %550 = vmatpush.msra.mxu2 %v2449_v41  ;;  %v2465_v45 = vld [vmem:[%s3943_s8 + $0xf0] sm:$0xff]  ;;  %v2471_v46 = vld [vmem:[%s3943_s8 + $0x68] sm:$0xff]  ;;  %vm1620_vm12 = vcmask 261312   ;;  %vm1624_vm13 = vcmask 326912   ;;  %vm1628_vm14 = vcmask 392512  }
  0xc6   : > { %510 = vperm.xlu0 %2101, %v505_v40   ;;  %570 = vmatpush.msra.mxu3 %v2454_v42  ;;  %v2477_v47 = vld [vmem:[%s3943_s8 + $0xe8] sm:$0xff]  ;;  %v2483_v48 = vld [vmem:[%s3943_s8 + $0x60] sm:$0xff]  ;;  %v2495_v50 = vld [vmem:[%s3943_s8 + $0x58] sm:$0xff]  ;;  %vm1632_vm15 = vcmask 458112   ;;  %s2053_s14 = sshll.u32 %s2296_s25, 4  ;;  %s1923_s16 = sshll.u32 %s2335_s29, 4  ;;  %s1924_s16 = int_to_ptr.vmem [resolvable:$true] %s1923_s16 }
  0xc7   : > { %551 = vmatpush.msra.mxu2 %v2460_v44  ;;  %v2489_v49 = vld [vmem:[%s3943_s8 + $0xe0] sm:$0xff]  ;;  %v2501_v51 = vld [vmem:[%s3943_s8 + $0xd8] sm:$0xff]  ;;  %v2507_v52 = vld [vmem:[%s3943_s8 + $0x50] sm:$0xff]  ;;  %s1921_s18 = scalar_lea.hbm %s3946_s11, %s2053_s14  ;;  %s1905_s19 = scalar_lea.sflag [#allocation4], %s2324_s15 }
  0xc8   : > { %571 = vmatpush.msra.mxu3 %v2465_v45  ;;  %v2513_v53 = vld [vmem:[%s3943_s8 + $0xd0] sm:$0xff]  ;;  %v2519_v54 = vld [vmem:[%s3943_s8 + $0x48] sm:$0xff]  ;;  %v2531_v56 = vld [vmem:[%s3943_s8 + $0x40] sm:$0xff]  ;;  %s1925_s17 = sshll.u32 %s1921_s18, 4  ;;  %s2132_s27 = scalar_lea.hbm %s3946_s11, 96  ;;  %s1926_s17 = int_to_ptr.hbm [resolvable:$true] %s1925_s17 }
  0xc9   : > { %552 = vmatpush.msra.mxu2 %v2471_v46  ;;  %v2525_v55 = vld [vmem:[%s3943_s8 + $0xc8] sm:$0xff]  ;;  %v2537_v57 = vld [vmem:[%s3943_s8 + $0xc0] sm:$0xff]  ;;  %v2543_v58 = vld [vmem:[%s3943_s8 + $0x38] sm:$0xff]  ;;  %s2126_s20 = sshra.s32 %s1926_s17, 4  ;;  %s2127_s20 = int_to_ptr.hbm [resolvable:$true] %s2126_s20 }
  0xca   : > { %572 = vmatpush.msra.mxu3 %v2477_v47  ;;  %v2549_v59 = vld [vmem:[%s3943_s8 + $0xb8] sm:$0xff]  ;;  %v2555_v60 = vld [vmem:[%s3943_s8 + $0x30] sm:$0xff]  ;;  %v2567_v62 = vld [vmem:[%s3943_s8 + $0x28] sm:$0xff]  ;;  %s2128_s28 = scalar_lea.hbm %s2127_s20, 16  ;;  %p2133_p1 = scmp.lt.s32.totalorder %s2127_s20, %s3946_s11 }
  0xcb   : > { %553 = vmatpush.msra.mxu2 %v2483_v48  ;;  %v2561_v61 = vld [vmem:[%s3943_s8 + $0xb0] sm:$0xff]  ;;  %v2573_v63 = vld [vmem:[%s3943_s8 + $0xa8] sm:$0xff]  ;;  %v2579_v0 = vld [vmem:[%s3943_s8 + $0x20] sm:$0xff]  ;;  %p2129_p12 = scmp.ne.s32.totalorder %s2127_s20, %s2128_s28  ;;  %p2134_p2 = scmp.lt.s32.totalorder %s2132_s27, %s2128_s28 }
  0xcc   : > { %573 = vmatpush.msra.mxu3 %v2489_v49  ;;  %v2585_v1 = vld [vmem:[%s3943_s8 + $0xa0] sm:$0xff]  ;;  %v2591_v2 = vld [vmem:[%s3943_s8 + $0x18] sm:$0xff]  ;;  %v2603_v4 = vld [vmem:[%s3943_s8 + $0x10] sm:$0xff] }
  0xcd   : > { %554 = vmatpush.msra.mxu2 %v2495_v50  ;;  %v2597_v3 = vld [vmem:[%s3943_s8 + $0x98] sm:$0xff]  ;;  %v2609_v5 = vld [vmem:[%s3943_s8 + $0x90] sm:$0xff]  ;;  %v2615_v6 = vld [vmem:[%s3943_s8 + $0x8] sm:$0xff]  ;;  %p2130_p13 = pnand %p2129_p12, %p2313_p5  ;;  %p2135_p3 = por %p2134_p2, %p2133_p1 }
  0xce   : > { %574 = vmatpush.msra.mxu3 %v2501_v51  ;;  %v2621_v7 = vld [vmem:[%s3943_s8 + $0x88] sm:$0xff]  ;;  %v2629_v8 = vld [vmem:[%s3943_s8] sm:$0xff]  ;;  %v632_v11 = vld [vmem:[%s3939_s4 + $0x150] sm:$0xff] }
  0xcf   : > { %555 = vmatpush.msra.mxu2 %v2507_v52  ;;  %v2634_v9 = vld [vmem:[%s3943_s8 + $0x80] sm:$0xff]  ;;  %v635_v10 = vld [vmem:[%s3939_s4 + $0x168] sm:$0xff]  ;;  %v629_v12 = vld [vmem:[%s3939_s4 + $0x138] sm:$0xff]  ;;  %p2131_p0 = pneg %p2130_p13 }
  0xd0   : > { %575 = vmatpush.msra.mxu3 %v2513_v53  ;;  %v626_v13 = vld [vmem:[%s3939_s4 + $0x120] sm:$0xff]  ;;  %v636_v14 = vld [vmem:[%s3939_s4 + $0x170] sm:$0xff]  ;;  %v637_v15 = vld [vmem:[%s3939_s4 + $0x178] sm:$0xff] }
  0xd1   : > { %556 = vmatpush.msra.mxu2 %v2519_v54  ;;  %v633_v16 = vld [vmem:[%s3939_s4 + $0x158] sm:$0xff]  ;;  %v634_v17 = vld [vmem:[%s3939_s4 + $0x160] sm:$0xff]  ;;  %v623_v18 = vld [vmem:[%s3939_s4 + $0x108] sm:$0xff]  ;;  %686 = vmatpush.msra.mxu0 %v637_v15  ;;  %p2136_p4 = pnand %p2135_p3, %p2131_p0 }
  0xd2   : > { %576 = vmatpush.msra.mxu3 %v2525_v55  ;;  %v630_v19 = vld [vmem:[%s3939_s4 + $0x140] sm:$0xff]  ;;  %v631_v20 = vld [vmem:[%s3939_s4 + $0x148] sm:$0xff]  ;;  %v620_v22 = vld [vmem:[%s3939_s4 + $0xf0] sm:$0xff] }
  0xd3   : > { %557 = vmatpush.msra.mxu2 %v2531_v56  ;;  %v751_v21 = vld [vmem:[%s3940_s5 + $0x168] sm:$0xff]  ;;  %687 = vmatpush.msra.mxu0 %v634_v17  ;;  %v628_v24 = vld [vmem:[%s3939_s4 + $0x130] sm:$0xff]  ;;  %v617_v26 = vld [vmem:[%s3939_s4 + $0xd8] sm:$0xff] }
  0xd4   : > { %577 = vmatpush.msra.mxu3 %v2537_v57  ;;  %v627_v23 = vld [vmem:[%s3939_s4 + $0x128] sm:$0xff]  ;;  %762 = vmatpush.msra.mxu1 %v751_v21  ;;  %v748_v25 = vld [vmem:[%s3940_s5 + $0x150] sm:$0xff]  ;;  %v745_v28 = vld [vmem:[%s3940_s5 + $0x138] sm:$0xff] }
  0xd5   : > { %558 = vmatpush.msra.mxu2 %v2543_v58  ;;  %688 = vmatpush.msra.mxu0 %v631_v20  ;;  %v624_v27 = vld [vmem:[%s3939_s4 + $0x110] sm:$0xff]  ;;  %v625_v29 = vld [vmem:[%s3939_s4 + $0x118] sm:$0xff]  ;;  %v742_v30 = vld [vmem:[%s3940_s5 + $0x120] sm:$0xff] }
  0xd6   : > { %578 = vmatpush.msra.mxu3 %v2549_v59  ;;  %763 = vmatpush.msra.mxu1 %v748_v25  ;;  %v614_v31 = vld [vmem:[%s3939_s4 + $0xc0] sm:$0xff]  ;;  %v621_v32 = vld [vmem:[%s3939_s4 + $0xf8] sm:$0xff]  ;;  %v739_v34 = vld [vmem:[%s3940_s5 + $0x108] sm:$0xff] }
  0xd7   : > { %559 = vmatpush.msra.mxu2 %v2555_v60  ;;  %689 = vmatpush.msra.mxu0 %v628_v24  ;;  %v622_v33 = vld [vmem:[%s3939_s4 + $0x100] sm:$0xff]  ;;  %v611_v35 = vld [vmem:[%s3939_s4 + $0xa8] sm:$0xff]  ;;  %v736_v38 = vld [vmem:[%s3940_s5 + $0xf0] sm:$0xff] }
  0xd8   : > { %579 = vmatpush.msra.mxu3 %v2561_v61  ;;  %764 = vmatpush.msra.mxu1 %v745_v28  ;;  %v618_v36 = vld [vmem:[%s3939_s4 + $0xe0] sm:$0xff]  ;;  %v619_v37 = vld [vmem:[%s3939_s4 + $0xe8] sm:$0xff]  ;;  %v608_v39 = vld [vmem:[%s3939_s4 + $0x90] sm:$0xff] }
  0xd9   : > { %560 = vmatpush.msra.mxu2 %v2567_v62  ;;  %690 = vmatpush.msra.mxu0 %v625_v29  ;;  %v615_v40 = vld [vmem:[%s3939_s4 + $0xc8] sm:$0xff]  ;;  %v616_v43 = vld [vmem:[%s3939_s4 + $0xd0] sm:$0xff]  ;;  %v730_v15 = vld [vmem:[%s3940_s5 + $0xc0] sm:$0xff] }
  0xda   : > { %580 = vmatpush.msra.mxu3 %v2573_v63  ;;  %765 = vmatpush.msra.mxu1 %v742_v30  ;;  %v609_v17 = vld [vmem:[%s3939_s4 + $0x98] sm:$0xff]  ;;  %v599_v20 = vld [vmem:[%s3939_s4 + $0x48] sm:$0xff]  ;;  %v606_v21 = vld [vmem:[%s3939_s4 + $0x80] sm:$0xff] }
  0xdb   : > { %561 = vmatpush.msra.mxu2 %v2579_v0  ;;  %691 = vmatpush.msra.mxu0 %v622_v33  ;;  %v724_v24 = vld [vmem:[%s3940_s5 + $0x90] sm:$0xff]  ;;  %v721_v28 = vld [vmem:[%s3940_s5 + $0x78] sm:$0xff]  ;;  %v590_v33 = vld [vmem:[%s3939_s4] sm:$0xff] }
  0xdc   : > { %581 = vmatpush.msra.mxu3 %v2585_v1  ;;  %766 = vmatpush.msra.mxu1 %v739_v34  ;;  %v596_v25 = vld [vmem:[%s3939_s4 + $0x30] sm:$0xff]  ;;  %v593_v29 = vld [vmem:[%s3939_s4 + $0x18] sm:$0xff] }
  0xdd   : > { %562 = vmatpush.msra.mxu2 %v2591_v2  ;;  %692 = vmatpush.msra.mxu0 %v619_v37  ;;  %v600_v30 = vld [vmem:[%s3939_s4 + $0x50] sm:$0xff]  ;;  %v597_v34 = vld [vmem:[%s3939_s4 + $0x38] sm:$0xff]  ;;  %v598_v37 = vld [vmem:[%s3939_s4 + $0x40] sm:$0xff] }
  0xde   : > { %582 = vmatpush.msra.mxu3 %v2597_v3  ;;  %767 = vmatpush.msra.mxu1 %v736_v38  ;;  %v594_v38 = vld [vmem:[%s3939_s4 + $0x20] sm:$0xff] }
  0xdf   : > { %563 = vmatpush.msra.mxu2 %v2603_v4  ;;  %693 = vmatpush.msra.mxu0 %v616_v43  ;;  %v746_v43 = vld [vmem:[%s3940_s5 + $0x140] sm:$0xff] }
  0xe0   : > { %583 = vmatpush.msra.mxu3 %v2609_v5 }
  0xe1   : > { %564 = vmatpush.msra.mxu2 %v2615_v6 }
  0xe2   : > { %584 = vmatpush.msra.mxu3 %v2621_v7 }
  0xe3   : > { %565 = vmatpush.msra.mxu2 %v2629_v8 }
  0xe4   : > { %585 = vmatpush.msra.mxu3 %v2634_v9 }
  0xe5   : > { %646 = vmatpush.msrb.mxu2 %v635_v10  ;;  %v733_v10 = vld [vmem:[%s3940_s5 + $0xd8] sm:$0xff] }
  0xe6   : > { %666 = vmatpush.msrb.mxu3 %v636_v14  ;;  %v613_v14 = vld [vmem:[%s3939_s4 + $0xb8] sm:$0xff]  ;;  %768 = vmatpush.msra.mxu1 %v733_v10  ;;  %v743_v10 = vld [vmem:[%s3940_s5 + $0x128] sm:$0xff] }
  0xe7   : > { %647 = vmatpush.msrb.mxu2 %v632_v11  ;;  %v605_v11 = vld [vmem:[%s3939_s4 + $0x78] sm:$0xff]  ;;  %694 = vmatpush.msra.mxu0 %v613_v14  ;;  %v731_v14 = vld [vmem:[%s3940_s5 + $0xc8] sm:$0xff] }
  0xe8   : > { %667 = vmatpush.msrb.mxu3 %v633_v16  ;;  %v602_v16 = vld [vmem:[%s3939_s4 + $0x60] sm:$0xff]  ;;  %769 = vmatpush.msra.mxu1 %v730_v15  ;;  %v728_v15 = vld [vmem:[%s3940_s5 + $0xb0] sm:$0xff] }
  0xe9   : > { %648 = vmatpush.msrb.mxu2 %v629_v12  ;;  %v612_v12 = vld [vmem:[%s3939_s4 + $0xb0] sm:$0xff] }
  0xea   : > { %668 = vmatpush.msrb.mxu3 %v630_v19  ;;  %v727_v19 = vld [vmem:[%s3940_s5 + $0xa8] sm:$0xff] }
  0xeb   : > { %649 = vmatpush.msrb.mxu2 %v626_v13  ;;  %v506_v13 = vlaneseq  ;;  %770 = vmatpush.msra.mxu1 %v727_v19  ;;  %v722_v19 = vld [vmem:[%s3940_s5 + $0x80] sm:$0xff] }
  0xec   : > { %669 = vmatpush.msrb.mxu3 %v627_v23  ;;  %v607_v23 = vld [vmem:[%s3939_s4 + $0x88] sm:$0xff] }
  0xed   : > { %650 = vmatpush.msrb.mxu2 %v623_v18  ;;  %v610_v18 = vld [vmem:[%s3939_s4 + $0xa0] sm:$0xff]  ;;  %771 = vmatpush.msra.mxu1 %v724_v24  ;;  %v719_v24 = vld [vmem:[%s3940_s5 + $0x68] sm:$0xff] }
  0xee   : > { %670 = vmatpush.msrb.mxu3 %v624_v27  ;;  %695 = vmatpush.msra.mxu0 %v610_v18  ;;  %v604_v27 = vld [vmem:[%s3939_s4 + $0x70] sm:$0xff]  ;;  %v718_v18 = vld [vmem:[%s3940_s5 + $0x60] sm:$0xff] }
  0xef   : > { %651 = vmatpush.msrb.mxu2 %v620_v22  ;;  %v2767_v22 = vand.u32 127, %v506_v13  ;;  %772 = vmatpush.msra.mxu1 %v721_v28  ;;  %v734_v13 = vld [vmem:[%s3940_s5 + $0xe0] sm:$0xff] }
  0xf0   : > { %671 = vmatpush.msrb.mxu3 %v621_v32  ;;  %696 = vmatpush.msra.mxu0 %v607_v23  ;;  %v601_v32 = vld [vmem:[%s3939_s4 + $0x58] sm:$0xff]  ;;  %v715_v23 = vld [vmem:[%s3940_s5 + $0x48] sm:$0xff]  ;;  %v750_v28 = vld [vmem:[%s3940_s5 + $0x160] sm:$0xff] }
  0xf1   : > { %652 = vmatpush.msrb.mxu2 %v617_v26  ;;  %v603_v26 = vld [vmem:[%s3939_s4 + $0x68] sm:$0xff]  ;;  %773 = vmatpush.msra.mxu1 %v718_v18 }
  0xf2   : > { %672 = vmatpush.msrb.mxu3 %v618_v36  ;;  %697 = vmatpush.msra.mxu0 %v604_v27  ;;  %v752_v36 = vld [vmem:[%s3940_s5 + $0x170] sm:$0xff] }
  0xf3   : > { %653 = vmatpush.msrb.mxu2 %v614_v31  ;;  %v508_v31 = vadd.s32 128, %v2767_v22  ;;  %774 = vmatpush.msra.mxu1 %v715_v23  ;;  %v716_v27 = vld [vmem:[%s3940_s5 + $0x50] sm:$0xff] }
  0xf4   : > { %673 = vmatpush.msrb.mxu3 %v615_v40  ;;  %698 = vmatpush.msra.mxu0 %v601_v32  ;;  %v749_v40 = vld [vmem:[%s3940_s5 + $0x158] sm:$0xff]  ;;  %v706_v32 = vld [vmem:[%s3940_s5] sm:$0xff] }
  0xf5   : > { %654 = vmatpush.msrb.mxu2 %v611_v35 }
  0xf6   : > { %674 = vmatpush.msrb.mxu3 %v612_v12  ;;  %699 = vmatpush.msra.mxu0 %v598_v37  ;;  %v737_v12 = vld [vmem:[%s3940_s5 + $0xf8] sm:$0xff]  ;;  %v738_v37 = vld [vmem:[%s3940_s5 + $0x100] sm:$0xff] }
  0xf7   : > { %655 = vmatpush.msrb.mxu2 %v608_v39  ;;  %v2209_v39 = vmov 1.0  }
  0xf8   : > { %675 = vmatpush.msrb.mxu3 %v609_v17  ;;  %v595_v17 = vld [vmem:[%s3939_s4 + $0x28] sm:$0xff] }
  0xf9   : > { %656 = vmatpush.msrb.mxu2 %v605_v11  ;;  %v740_v11 = vld [vmem:[%s3940_s5 + $0x110] sm:$0xff]  ;;  %700 = vmatpush.msra.mxu0 %v595_v17 }
  0xfa   : > { %676 = vmatpush.msrb.mxu3 %v606_v21  ;;  %v592_v21 = vld [vmem:[%s3939_s4 + $0x10] sm:$0xff] }
  0xfb   : > { %657 = vmatpush.msrb.mxu2 %v602_v16  ;;  %v725_v16 = vld [vmem:[%s3940_s5 + $0x98] sm:$0xff]  ;;  %701 = vmatpush.msra.mxu0 %v592_v21 }
  0xfc   : > { %677 = vmatpush.msrb.mxu3 %v603_v26  ;;  %v712_v26 = vld [vmem:[%s3940_s5 + $0x30] sm:$0xff] }
  0xfd   : > { %658 = vmatpush.msrb.mxu2 %v599_v20  ;;  %v591_v20 = vld [vmem:[%s3939_s4 + $0x8] sm:$0xff]  ;;  %902 = vmatpush.xpose.msrb.mxu0 %v2449_v41  ;;  %v710_v41 = vld [vmem:[%s3940_s5 + $0x20] sm:$0xff] }
  0xfe   : > { %678 = vmatpush.msrb.mxu3 %v600_v30  ;;  %775 = vmatpush.msra.mxu1 %v712_v26  ;;  %v713_v30 = vld [vmem:[%s3940_s5 + $0x38] sm:$0xff] }
  0xff   : > { %659 = vmatpush.msrb.mxu2 %v596_v25  ;;  %v753_v25 = vld [vmem:[%s3940_s5 + $0x178] sm:$0xff] }
 0x100   : > { %679 = vmatpush.msrb.mxu3 %v597_v34  ;;  %v2892_v34 = vld [vmem:[#allocation2] sm:$0xff] }
 0x101   : > { %660 = vmatpush.msrb.mxu2 %v593_v29  ;;  %v709_v29 = vld [vmem:[%s3940_s5 + $0x18] sm:$0xff]  ;;  %903 = vmatpush.xpose.msrb.mxu0 %v2460_v44  ;;  %v735_v44 = vld [vmem:[%s3940_s5 + $0xe8] sm:$0xff] }
 0x102   : > { %680 = vmatpush.msrb.mxu3 %v594_v38  ;;  %776 = vmatpush.msra.mxu1 %v709_v29  ;;  %v732_v38 = vld [vmem:[%s3940_s5 + $0xd0] sm:$0xff] }
 0x103   : > { %661 = vmatpush.msrb.mxu2 %v590_v33  ;;  %v744_v33 = vld [vmem:[%s3940_s5 + $0x130] sm:$0xff] }
 0x104   : > { %681 = vmatpush.msrb.mxu3 %v591_v20  ;;  %777 = vmatpush.msra.mxu1 %v706_v32 }
 0x105   : > { %778 = vmatmul.f32.vlgmr.msra.gmra.mxu1 %v2892_v34  ;;  %904 = vmatpush.xpose.msrb.mxu0 %v2471_v46  ;;  %v726_v46 = vld [vmem:[%s3940_s5 + $0xa0] sm:$0xff] }
 0x106   : > { %922 = vmatpush.xpose.msrb.mxu1 %v2454_v42  ;;  %v729_v42 = vld [vmem:[%s3940_s5 + $0xb8] sm:$0xff] }
 0x109   : > { %905 = vmatpush.xpose.msrb.mxu0 %v2483_v48  ;;  %v720_v48 = vld [vmem:[%s3940_s5 + $0x70] sm:$0xff] }
 0x10a   : > { %923 = vmatpush.xpose.msrb.mxu1 %v2465_v45  ;;  %v723_v45 = vld [vmem:[%s3940_s5 + $0x88] sm:$0xff] }
 0x10d   : > { %906 = vmatpush.xpose.msrb.mxu0 %v2495_v50  ;;  %v714_v50 = vld [vmem:[%s3940_s5 + $0x40] sm:$0xff] }
 0x10e   : > { %924 = vmatpush.xpose.msrb.mxu1 %v2477_v47  ;;  %v717_v47 = vld [vmem:[%s3940_s5 + $0x58] sm:$0xff] }
 0x111   : > { %907 = vmatpush.xpose.msrb.mxu0 %v2507_v52  ;;  %v708_v52 = vld [vmem:[%s3940_s5 + $0x10] sm:$0xff] }
 0x112   : > { %925 = vmatpush.xpose.msrb.mxu1 %v2489_v49  ;;  %v711_v49 = vld [vmem:[%s3940_s5 + $0x28] sm:$0xff] }
 0x115   : > { %908 = vmatpush.xpose.msrb.mxu0 %v2519_v54 }
 0x116   : > { %926 = vmatpush.xpose.msrb.mxu1 %v2501_v51 }
 0x119   : > { %909 = vmatpush.xpose.msrb.mxu0 %v2531_v56 }
 0x11a   : > { %927 = vmatpush.xpose.msrb.mxu1 %v2513_v53  ;;  %v754_v53 = vld [vmem:[%s3942_s7] sm:$0x7] }
 0x11b   : > { %v756_v54 = vperm.slane %v754_v53, 0 }
 0x11d   : > { %910 = vmatpush.xpose.msrb.mxu0 %v2543_v58 }
 0x11e   : > { %928 = vmatpush.xpose.msrb.mxu1 %v2525_v55  ;;  %v638_v55 = vld [vmem:[%s3941_s6] sm:$0x7] }
 0x11f   : > { %v642_v18 = vperm.slane %v638_v55, 2 }
 0x121   : > { %911 = vmatpush.xpose.msrb.mxu0 %v2555_v60 }
 0x122   : > { %929 = vmatpush.xpose.msrb.mxu1 %v2537_v57  ;;  %v640_v57 = vperm.slane %v638_v55, 0 }
 0x125   : > { %912 = vmatpush.xpose.msrb.mxu0 %v2567_v62  ;;  %v641_v62 = vperm.slane %v638_v55, 1 }
 0x126   : > { %930 = vmatpush.xpose.msrb.mxu1 %v2549_v59 }
 0x129   : > { %913 = vmatpush.xpose.msrb.mxu0 %v2579_v0  ;;  %v757_v0 = vperm.slane %v754_v53, 1 }
 0x12a   : > { %931 = vmatpush.xpose.msrb.mxu1 %v2561_v61 }
 0x12d   : > { %914 = vmatpush.xpose.msrb.mxu0 %v2591_v2 }
 0x12e   : > { %932 = vmatpush.xpose.msrb.mxu1 %v2573_v63 }
 0x131   : > { %915 = vmatpush.xpose.msrb.mxu0 %v2603_v4 }
 0x132   : > { %933 = vmatpush.xpose.msrb.mxu1 %v2585_v1 }
 0x135   : > { %916 = vmatpush.xpose.msrb.mxu0 %v2615_v6 }
 0x136   : > { %934 = vmatpush.xpose.msrb.mxu1 %v2597_v3 }
 0x138   : > { %v511_v35 = vpop.permute.xlu0 %510 }
 0x139   : > { %vm512_vm0 = vcmp.eq.s32.totalorder %v2767_v22, %v511_v35  ;;  %vm513_vm1 = vcmp.eq.s32.totalorder %v508_v31, %v511_v35  ;;  %v747_v31 = vld [vmem:[%s3940_s5 + $0x148] sm:$0xff]  ;;  %917 = vmatpush.xpose.msrb.mxu0 %v2629_v8 }
 0x13a   : > { %2042 = vmatmul.msk.f32.vlgmr.msra.gmra.mxu2 %vm512_vm0, %v2209_v39  ;;  %2043 = vmatmul.msk.f32.vlgmr.msra.gmra.mxu3 %vm513_vm1, %v2209_v39  ;;  %v707_v35 = vld [vmem:[%s3940_s5 + $0x8] sm:$0xff]  ;;  %vm1636_vm0 = vcmask 523712   ;;  %vm1640_vm1 = vcmask 589312  }
 0x13b   : > { %782 = vmatpush.msra.mxu2 %v752_v36  ;;  %802 = vmatpush.msra.mxu3 %v753_v25  ;;  %v741_v36 = vld [vmem:[%s3940_s5 + $0x118] sm:$0xff] }
 0x13c   : > { %935 = vmatpush.xpose.msrb.mxu1 %v2609_v5 }
 0x13d   : > { %783 = vmatpush.msra.mxu2 %v749_v40  ;;  %803 = vmatpush.msra.mxu3 %v750_v28 }
 0x13f   : > { %784 = vmatpush.msra.mxu2 %v746_v43  ;;  %804 = vmatpush.msra.mxu3 %v747_v31 }
 0x140   : > { %936 = vmatpush.xpose.msrb.mxu1 %v2621_v7 }
 0x141   : > { %785 = vmatpush.msra.mxu2 %v743_v10  ;;  %805 = vmatpush.msra.mxu3 %v744_v33 }
 0x143   : > { %786 = vmatpush.msra.mxu2 %v740_v11  ;;  %806 = vmatpush.msra.mxu3 %v741_v36 }
 0x144   : > { %937 = vmatpush.xpose.msrb.mxu1 %v2634_v9 }
 0x145   : > { %787 = vmatpush.msra.mxu2 %v737_v12  ;;  %807 = vmatpush.msra.mxu3 %v738_v37  ;;  %v758_v12 = vperm.slane %v754_v53, 2  ;;  %v946_v53 = vld [vmem:[%s3944_s9 + $0x10] sm:$0xff] }
 0x147   : > { %788 = vmatpush.msra.mxu2 %v734_v13  ;;  %808 = vmatpush.msra.mxu3 %v735_v44 }
 0x149   : > { %789 = vmatpush.msra.mxu2 %v731_v14  ;;  %809 = vmatpush.msra.mxu3 %v732_v38 }
 0x14b   : > { %790 = vmatpush.msra.mxu2 %v728_v15  ;;  %810 = vmatpush.msra.mxu3 %v729_v42 }
 0x14d   : > { %791 = vmatpush.msra.mxu2 %v725_v16  ;;  %811 = vmatpush.msra.mxu3 %v726_v46 }
 0x14f   : > { %792 = vmatpush.msra.mxu2 %v722_v19  ;;  %812 = vmatpush.msra.mxu3 %v723_v45 }
 0x151   : > { %793 = vmatpush.msra.mxu2 %v719_v24  ;;  %813 = vmatpush.msra.mxu3 %v720_v48 }
 0x153   : > { %794 = vmatpush.msra.mxu2 %v716_v27  ;;  %814 = vmatpush.msra.mxu3 %v717_v47  ;;  %v947_v47 = vld [vmem:[%s3944_s9 + $0x18] sm:$0xff] }
 0x155   : > { %795 = vmatpush.msra.mxu2 %v713_v30  ;;  %815 = vmatpush.msra.mxu3 %v714_v50 }
 0x157   : > { %796 = vmatpush.msra.mxu2 %v710_v41  ;;  %816 = vmatpush.msra.mxu3 %v711_v49  ;;  %v945_v49 = vld [vmem:[%s3944_s9 + $0x8] sm:$0xff] }
 0x159   : > { %797 = vmatpush.msra.mxu2 %v707_v35  ;;  %817 = vmatpush.msra.mxu3 %v708_v52 }
 0x182   : > { %v779_v56 = vpop.f32.mrf.mxu1 }
 0x183   : > { %v780_v58 = vadd.f32 %v779_v56, %v756_v54  ;;  %v959_v54 = vld [vmem:[%s3944_s9 + $0x78] sm:$0xff] }
 0x1bd   : > { %v567_v39 = vpop.f32.mrf.mxu2  ;;  %v587_v40 = vpop.f32.mrf.mxu3 }
 0x1be   : > { %v588_v51 = vadd.f32 %v587_v40, %v567_v39 }
 0x1c0   : > { %662 = vmatmul.f32.vlgmr.msrb.gmra.mxu2 %v588_v51  ;;  %682 = vmatmul.f32.vlgmr.msrb.gmra.mxu3 %v588_v51 }
 0x1c1   : > { %702 = vmatmul.f32.vlgmr.msra.gmra.mxu0 %v588_v51  ;;  %v948_v51 = vld [vmem:[%s3944_s9 + $0x20] sm:$0xff] }
 0x1c8   : > { %798 = vmatmul.f32.vlgmr.msra.gmra.mxu2 %v2892_v34  ;;  %818 = vmatmul.f32.vlgmr.msra.gmra.mxu3 %v2892_v34 }
 0x23e   : > { %v703_v23 = vpop.f32.mrf.mxu0 }
 0x23f   : > { %v704_v28 = vadd.f32 %v703_v23, %v642_v18 }
 0x243   : > { %v663_v59 = vpop.f32.mrf.mxu2  ;;  %v683_v1 = vpop.f32.mrf.mxu3 }
 0x244   : > { %v664_v60 = vadd.f32 %v663_v59, %v640_v57  ;;  %v684_v3 = vadd.f32 %v683_v1, %v641_v62  ;;  %v962_v62 = vld [vmem:[%s3944_s9 + $0x90] sm:$0xff] }
 0x246   : > { %v822_v61 = vadd.f32 %v780_v58, %v664_v60  ;;  %v950_v60 = vld [vmem:[%s3944_s9 + $0x30] sm:$0xff] }
 0x248   : > { %v2044_v63 = vmul.f32 -1.442695, %v822_v61  ;;  %v949_v61 = vld [vmem:[%s3944_s9 + $0x28] sm:$0xff] }
 0x24a   : > { %2102 = vpow2.f32 %v2044_v63 }
 0x24b   : > { %v799_v2 = vpop.f32.mrf.mxu2  ;;  %v819_v14 = vpop.f32.mrf.mxu3 }
 0x24c   : > { %v800_v4 = vadd.f32 %v799_v2, %v757_v0  ;;  %v820_v19 = vadd.f32 %v819_v14, %v758_v12  ;;  %v952_v2 = vld [vmem:[%s3944_s9 + $0x40] sm:$0xff]  ;;  %v955_v14 = vld [vmem:[%s3944_s9 + $0x58] sm:$0xff] }
 0x24e   : > { %v842_v5 = vadd.f32 %v800_v4, %v684_v3  ;;  %v951_v3 = vld [vmem:[%s3944_s9 + $0x38] sm:$0xff]  ;;  %v965_v4 = vld [vmem:[%s3944_s9 + $0xa8] sm:$0xff] }
 0x250   : > { %v2103_v6 = vpop.eup %2102  ;;  %v2045_v7 = vmul.f32 -1.442695, %v842_v5 }
 0x251   : > { %v826_v8 = vadd.f32 1.0, %v2103_v6 }
 0x252   : > { %2104 = vpow2.f32 %v2045_v7 }
 0x253   : > { %2106 = vrcp.f32 %v826_v8  ;;  %v838_v15 = vand.u32 2147483648, %v826_v8  ;;  %v836_v17 = vand.u32 2147483647, %v826_v8  ;;  %vm832_vm3 = vweird.f32 %v826_v8 }
 0x255   : > { %v839_v24 = vor.u32 1.1754944e-38, %v838_v15  ;;  %vm837_vm5 = vcmp.eq.f32.partialorder %v836_v17, 8.507059e+37  ;;  %v971_v15 = vld [vmem:[%s3944_s9 + $0xd8] sm:$0xff] }
 0x258   : > { %v2105_v9 = vpop.eup %2104 }
 0x259   : > { %v2107_v43 = vpop.eup %2106  ;;  %v846_v10 = vadd.f32 1.0, %v2105_v9  ;;  %v953_v9 = vld [vmem:[%s3944_s9 + $0x48] sm:$0xff] }
 0x25a   : > { %v828_v11 = vmul.f32 %v2107_v43, %v826_v8  ;;  %vm833_vm2 = vweird.f32 %v2107_v43  ;;  %v954_v8 = vld [vmem:[%s3944_s9 + $0x50] sm:$0xff] }
 0x25b   : > { %2108 = vrcp.f32 %v846_v10  ;;  %vm834_vm4 = vmor %vm832_vm3, %vm833_vm2  ;;  %v858_v31 = vand.u32 2147483648, %v846_v10  ;;  %v856_v41 = vand.u32 2147483647, %v846_v10  ;;  %vm852_vm7 = vweird.f32 %v846_v10 }
 0x25c   : > { %v829_v13 = vsub.f32 1.0, %v828_v11  ;;  %vm1644_vm2 = vcmask 654912   ;;  %vm1648_vm3 = vcmask 720512  }
 0x25d   : > { %v859_v36 = vor.u32 1.1754944e-38, %v858_v31  ;;  %vm857_vm9 = vcmp.eq.f32.partialorder %v856_v41, 8.507059e+37 }
 0x25e   : > { %v830_v16 = vmul.f32 %v2107_v43, %v829_v13  ;;  %v956_v13 = vld [vmem:[%s3944_s9 + $0x60] sm:$0xff] }
 0x260   : > { %v831_v20 = vadd.f32 %v2107_v43, %v830_v16 }
 0x261   : > { %v2109_v21 = vpop.eup %2108 }
 0x262   : > { %v848_v25 = vmul.f32 %v2109_v21, %v846_v10  ;;  %v835_v26 = vsel %vm834_vm4, %v2107_v43, %v831_v20  ;;  %vm853_vm6 = vweird.f32 %v2109_v21  ;;  %v968_v43 = vld [vmem:[%s3944_s9 + $0xc0] sm:$0xff]  ;;  %v957_v20 = vld [vmem:[%s3944_s9 + $0x68] sm:$0xff]  ;;  %vm1652_vm4 = vcmask 786112  }
 0x263   : > { %v840_v27 = vsel %vm837_vm5, %v839_v24, %v835_v26  ;;  %vm854_vm8 = vmor %vm852_vm7, %vm853_vm6  ;;  %vm1656_vm5 = vcmask 851712   ;;  %vm1660_vm6 = vcmask 917312   ;;  %vm1664_vm7 = vcmask 982912  }
 0x264   : > { %v849_v29 = vsub.f32 1.0, %v848_v25  ;;  %v862_v30 = vmul.f32 %v840_v27, %v820_v19  ;;  %v958_v19 = vld [vmem:[%s3944_s9 + $0x70] sm:$0xff] }
 0x266   : > { %v850_v32 = vmul.f32 %v2109_v21, %v849_v29  ;;  %v863_v33 = vadd.f32 %v862_v30, %v704_v28  ;;  %v961_v28 = vld [vmem:[%s3944_s9 + $0x88] sm:$0xff]  ;;  %v960_v30 = vld [vmem:[%s3944_s9 + $0x80] sm:$0xff] }
 0x267   : > { %v977_v29 = vld [vmem:[%s3944_s9 + $0x108] sm:$0xff] }
 0x268   : > { %v851_v35 = vadd.f32 %v2109_v21, %v850_v32  ;;  %2110 = vtanh.f32 %v863_v33  ;;  %v964_v33 = vld [vmem:[%s3944_s9 + $0xa0] sm:$0xff] }
 0x26a   : > { %v855_v37 = vsel %vm854_vm8, %v2109_v21, %v851_v35  ;;  %v974_v21 = vld [vmem:[%s3944_s9 + $0xf0] sm:$0xff]  ;;  %v980_v35 = vld [vmem:[%s3944_s9 + $0x120] sm:$0xff]  ;;  %vm1668_vm8 = vcmask 1048512  }
 0x26b   : > { %v860_v44 = vsel %vm857_vm9, %v859_v36, %v855_v37  ;;  %v963_v36 = vld [vmem:[%s3944_s9 + $0x98] sm:$0xff]  ;;  %vm1887_vm9 = vcmask 1041409  }
 0x26c   : > { %v865_v38 = vsub.f32 1.0, %v860_v44  ;;  %v867_v45 = vmul.f32 %v860_v44, %v2892_v34  ;;  %v944_v34 = vld [vmem:[%s3944_s9] sm:$0xff] }
 0x26e   : > { %v2111_v42 = vpop.eup %2110 }
 0x26f   : > { %v866_v46 = vmul.f32 %v2111_v42, %v865_v38  ;;  %v967_v42 = vld [vmem:[%s3944_s9 + $0xb8] sm:$0xff] }
 0x271   : > { %v2974_v48 = vadd.f32 %v867_v45, %v866_v46  ;;  %v983_v46 = vld [vmem:[%s3944_s9 + $0x138] sm:$0xff]  ;;  %v966_v45 = vld [vmem:[%s3944_s9 + $0xb0] sm:$0xff] }
 0x273   : > { %869 = vst [vmem:[#allocation2] sm:$0xff] %v2974_v48  ;;  %918 = vmatmul.f32.vlgmr.msrb.gmra.mxu0 %v2974_v48  ;;  %938 = vmatmul.f32.vlgmr.msrb.gmra.mxu1 %v2974_v48  ;;  %v1080_v50 = vperm.slane %v2974_v48, 0  ;;  %v1073_v56 = vrot.slane %v2974_v48, 1  ;;  %v1074_v24 = vrot.slane %v2974_v48, 2 }
 0x275   : > { %v1099_v52 = vmul.f32 %v1080_v50, %v947_v47  ;;  %v1097_v39 = vmul.f32 %v1080_v50, %v945_v49  ;;  %v1096_v40 = vmul.f32 %v1080_v50, %v944_v34  ;;  %v1100_v55 = vmul.f32 %v1080_v50, %v948_v51  ;;  %v970_v34 = vld [vmem:[%s3944_s9 + $0xd0] sm:$0xff] }
 0x276   : > { %v1098_v57 = vmul.f32 %v1080_v50, %v946_v53  ;;  %v1111_v58 = vmul.f32 %v1080_v50, %v959_v54  ;;  %v2999_v59 = vperm.slane %v1073_v56, 0  ;;  %v1102_v63 = vmul.f32 %v1080_v50, %v950_v60  ;;  %v973_v54 = vld [vmem:[%s3944_s9 + $0xe8] sm:$0xff]  ;;  %v972_v56 = vld [vmem:[%s3944_s9 + $0xe0] sm:$0xff] }
 0x277   : > { %1230 = vadd.xlane.f32.xlu2 %v1099_v52  ;;  %1226 = vadd.xlane.f32.xlu1 %v1097_v39  ;;  %v1101_v0 = vmul.f32 %v1080_v50, %v949_v61  ;;  %v1104_v5 = vmul.f32 %v1080_v50, %v952_v2  ;;  %v1103_v6 = vmul.f32 %v1080_v50, %v951_v3  ;;  %v3052_v27 = vperm.slane %v1074_v24, 0  ;;  %v986_v52 = vld [vmem:[%s3944_s9 + $0x150] sm:$0xff]  ;;  %v969_v39 = vld [vmem:[%s3944_s9 + $0xc8] sm:$0xff] }
 0x278   : > { %1224 = vadd.xlane.f32.xlu0 %v1096_v40  ;;  %v1114_v1 = vmul.f32 %v2999_v59, %v962_v62  ;;  %v1117_v7 = vmul.f32 %v2999_v59, %v965_v4  ;;  %v1106_v10 = vmul.f32 %v1080_v50, %v954_v8  ;;  %v1105_v11 = vmul.f32 %v1080_v50, %v953_v9 }
 0x279   : > { %v1120_v12 = vmul.f32 %v2999_v59, %v968_v43  ;;  %v1108_v16 = vmul.f32 %v1080_v50, %v956_v13  ;;  %v1107_v17 = vmul.f32 %v1080_v50, %v955_v14  ;;  %v1123_v18 = vmul.f32 %v2999_v59, %v971_v15  ;;  %v982_v43 = vld [vmem:[%s3944_s9 + $0x130] sm:$0xff] }
 0x27a   : > { %v1110_v23 = vmul.f32 %v1080_v50, %v958_v19  ;;  %v1109_v25 = vmul.f32 %v1080_v50, %v957_v20  ;;  %v1126_v26 = vmul.f32 %v2999_v59, %v974_v21  ;;  %v1113_v31 = vmul.f32 %v2999_v59, %v961_v28  ;;  %v1001_v20 = vld [vmem:[%s3944_s9 + $0x1c8] sm:$0xff]  ;;  %v984_v21 = vld [vmem:[%s3944_s9 + $0x140] sm:$0xff] }
 0x27b   : > { %v1129_v32 = vmul.f32 %v3052_v27, %v977_v29  ;;  %v1112_v41 = vmul.f32 %v2999_v59, %v960_v30  ;;  %v1116_v37 = vmul.f32 %v2999_v59, %v964_v33  ;;  %v1132_v44 = vmul.f32 %v3052_v27, %v980_v35 }
 0x27c   : > { %v1115_v38 = vmul.f32 %v2999_v59, %v963_v36  ;;  %v1119_v47 = vmul.f32 %v2999_v59, %v967_v42  ;;  %v1135_v50 = vmul.f32 %v3052_v27, %v983_v46  ;;  %v1118_v49 = vmul.f32 %v2999_v59, %v966_v45  ;;  %v988_v36 = vld [vmem:[%s3944_s9 + $0x160] sm:$0xff]  ;;  %v987_v42 = vld [vmem:[%s3944_s9 + $0x158] sm:$0xff] }
 0x27d   : > { %v1122_v40 = vmul.f32 %v2999_v59, %v970_v34  ;;  %v1138_v51 = vmul.f32 %v3052_v27, %v986_v52  ;;  %v1121_v53 = vmul.f32 %v2999_v59, %v969_v39  ;;  %v1124_v61 = vmul.f32 %v2999_v59, %v972_v56 }
 0x27e   : > { %v3154_v15 = vadd.s32 4294967288, %v2767_v22  ;;  %v1136_v29 = vmul.f32 %v3052_v27, %v984_v21  ;;  %v3180_v33 = vadd.s32 4294967264, %v2767_v22  ;;  %v1139_v52 = vmul.f32 %v3052_v27, %v987_v42 }
 0x27f   : > { %1232 = vadd.xlane.f32.xlu2 %v1100_v55  ;;  %1228 = vadd.xlane.f32.xlu1 %v1098_v57  ;;  %v989_v55 = vld [vmem:[%s3944_s9 + $0x168] sm:$0xff]  ;;  %v1125_v57 = vmul.f32 %v2999_v59, %v973_v54  ;;  %v3257_v21 = vadd.s32 4294967224, %v2767_v22  ;;  %v3277_v42 = vadd.s32 4294967200, %v2767_v22 }
 0x280   : > { %1254 = vadd.xlane.f32.xlu0 %v1111_v58  ;;  %v1075_v58 = vrot.slane %v2974_v48, 3  ;;  %v1141_v60 = vmul.f32 %v3052_v27, %v989_v55  ;;  %v991_v55 = vld [vmem:[%s3944_s9 + $0x178] sm:$0xff] }
 0x282   : > { %v3115_v62 = vperm.slane %v1075_v58, 0 }
 0x284   : > { %v1153_v28 = vmul.f32 %v3115_v62, %v1001_v20 }
 0x287   : > { %1236 = vadd.xlane.f32.xlu2 %v1102_v63  ;;  %1234 = vadd.xlane.f32.xlu1 %v1101_v0  ;;  %v976_v63 = vld [vmem:[%s3944_s9 + $0x100] sm:$0xff] }
 0x288   : > { %1260 = vadd.xlane.f32.xlu0 %v1114_v1  ;;  %v992_v0 = vld [vmem:[%s3944_s9 + $0x180] sm:$0xff]  ;;  %v975_v1 = vld [vmem:[%s3944_s9 + $0xf8] sm:$0xff]  ;;  %v1128_v2 = vmul.f32 %v3052_v27, %v976_v63 }
 0x289   : > { %v1144_v3 = vmul.f32 %v3115_v62, %v992_v0  ;;  %v1127_v4 = vmul.f32 %v2999_v59, %v975_v1  ;;  %v1143_v0 = vmul.f32 %v3052_v27, %v991_v55  ;;  %v1076_v1 = vrot.slane %v2974_v48, 4 }
 0x28f   : > { %1240 = vadd.xlane.f32.xlu2 %v1104_v5  ;;  %1238 = vadd.xlane.f32.xlu1 %v1103_v6  ;;  %v979_v5 = vld [vmem:[%s3944_s9 + $0x118] sm:$0xff] }
 0x290   : > { %1266 = vadd.xlane.f32.xlu0 %v1117_v7  ;;  %v995_v6 = vld [vmem:[%s3944_s9 + $0x198] sm:$0xff]  ;;  %v978_v7 = vld [vmem:[%s3944_s9 + $0x110] sm:$0xff]  ;;  %v1131_v8 = vmul.f32 %v3052_v27, %v979_v5  ;;  %v3227_v5 = vadd.s32 4294967232, %v2767_v22 }
 0x291   : > { %v1147_v9 = vmul.f32 %v3115_v62, %v995_v6  ;;  %v1130_v59 = vmul.f32 %v3052_v27, %v978_v7  ;;  %v3231_v7 = vadd.s32 4294967240, %v2767_v22 }
 0x297   : > { %1244 = vadd.xlane.f32.xlu2 %v1106_v10  ;;  %1242 = vadd.xlane.f32.xlu1 %v1105_v11  ;;  %v998_v10 = vld [vmem:[%s3944_s9 + $0x1b0] sm:$0xff]  ;;  %v981_v11 = vld [vmem:[%s3944_s9 + $0x128] sm:$0xff] }
 0x298   : > { %1272 = vadd.xlane.f32.xlu0 %v1120_v12  ;;  %v1134_v12 = vmul.f32 %v3052_v27, %v982_v43  ;;  %v1150_v13 = vmul.f32 %v3115_v62, %v998_v10  ;;  %v1133_v14 = vmul.f32 %v3052_v27, %v981_v11  ;;  %v1010_v11 = vld [vmem:[%s3944_s9 + $0x210] sm:$0xff] }
 0x29f   : > { %1248 = vadd.xlane.f32.xlu2 %v1108_v16  ;;  %1246 = vadd.xlane.f32.xlu1 %v1107_v17  ;;  %v985_v17 = vld [vmem:[%s3944_s9 + $0x148] sm:$0xff] }
 0x2a0   : > { %1278 = vadd.xlane.f32.xlu0 %v1123_v18 }
 0x2a7   : > { %1252 = vadd.xlane.f32.xlu2 %v1110_v23  ;;  %1250 = vadd.xlane.f32.xlu1 %v1109_v25  ;;  %v1137_v25 = vmul.f32 %v3052_v27, %v985_v17 }
 0x2a8   : > { %1284 = vadd.xlane.f32.xlu0 %v1126_v26 }
 0x2af   : > { %1258 = vadd.xlane.f32.xlu2 %v1113_v31  ;;  %1256 = vadd.xlane.f32.xlu1 %v1112_v41  ;;  %v3176_v41 = vadd.s32 4294967272, %v2767_v22 }
 0x2b0   : > { %1290 = vadd.xlane.f32.xlu0 %v1129_v32  ;;  %v3173_v32 = vadd.s32 4294967280, %v2767_v22 }
 0x2b7   : > { %1264 = vadd.xlane.f32.xlu2 %v1116_v37  ;;  %1262 = vadd.xlane.f32.xlu1 %v1115_v38  ;;  %v1004_v38 = vld [vmem:[%s3944_s9 + $0x1e0] sm:$0xff] }
 0x2b8   : > { %1296 = vadd.xlane.f32.xlu0 %v1132_v44  ;;  %v1156_v34 = vmul.f32 %v3115_v62, %v1004_v38 }
 0x2bf   : > { %1270 = vadd.xlane.f32.xlu2 %v1119_v47  ;;  %1268 = vadd.xlane.f32.xlu1 %v1118_v49  ;;  %v1140_v47 = vmul.f32 %v3052_v27, %v988_v36 }
 0x2c0   : > { %1302 = vadd.xlane.f32.xlu0 %v1135_v50 }
 0x2c7   : > { %1276 = vadd.xlane.f32.xlu2 %v1122_v40  ;;  %1274 = vadd.xlane.f32.xlu1 %v1121_v53  ;;  %v3202_v40 = vadd.s32 4294967248, %v2767_v22 }
 0x2c8   : > { %1308 = vadd.xlane.f32.xlu0 %v1138_v51  ;;  %v3205_v51 = vadd.s32 4294967256, %v2767_v22 }
 0x2cf   : > { %1282 = vadd.xlane.f32.xlu2 %v1125_v57  ;;  %1280 = vadd.xlane.f32.xlu1 %v1124_v61  ;;  %v990_v61 = vld [vmem:[%s3944_s9 + $0x170] sm:$0xff] }
 0x2d0   : > { %1314 = vadd.xlane.f32.xlu0 %v1141_v60  ;;  %v1007_v60 = vld [vmem:[%s3944_s9 + $0x1f8] sm:$0xff] }
 0x2d7   : > { %1288 = vadd.xlane.f32.xlu2 %v1128_v2  ;;  %1286 = vadd.xlane.f32.xlu1 %v1127_v4  ;;  %v1142_v4 = vmul.f32 %v3052_v27, %v990_v61  ;;  %v3301_v61 = vadd.s32 4294967184, %v2767_v22 }
 0x2d8   : > { %1320 = vadd.xlane.f32.xlu0 %v1144_v3  ;;  %v1159_v3 = vmul.f32 %v3115_v62, %v1007_v60 }
 0x2df   : > { %1294 = vadd.xlane.f32.xlu2 %v1131_v8  ;;  %1292 = vadd.xlane.f32.xlu1 %v1130_v59  ;;  %v3233_v8 = vperm.slane %v1076_v1, 0  ;;  %v994_v59 = vld [vmem:[%s3944_s9 + $0x190] sm:$0xff]  ;;  %v3308_v1 = vadd.s32 4294967176, %v2767_v22 }
 0x2e0   : > { %1326 = vadd.xlane.f32.xlu0 %v1147_v9 }
 0x2e1   : > { %v1162_v17 = vmul.f32 %v3233_v8, %v1010_v11 }
 0x2e7   : > { %1300 = vadd.xlane.f32.xlu2 %v1134_v12  ;;  %1298 = vadd.xlane.f32.xlu1 %v1133_v14  ;;  %v993_v12 = vld [vmem:[%s3944_s9 + $0x188] sm:$0xff]  ;;  %v1146_v14 = vmul.f32 %v3115_v62, %v994_v59  ;;  %v1019_v59 = vld [vmem:[%s3944_s9 + $0x258] sm:$0xff] }
 0x2e8   : > { %1332 = vadd.xlane.f32.xlu0 %v1150_v13 }
 0x2ea   : > { %v1231_v16 = vpop.xlane.xlu2 %1230  ;;  %v1227_v18 = vpop.xlane.xlu1 %1226 }
 0x2eb   : > { %v1225_v19 = vpop.xlane.xlu0 %1224  ;;  %v1611_v23 = vperm.slane %v1227_v18, %v3154_v15  ;;  %v1619_v45 = vperm.slane %v1231_v16, %v3176_v41  ;;  %v1145_v18 = vmul.f32 %v3115_v62, %v993_v12 }
 0x2ec   : > { %v1609_v24 = vperm.slane %v1225_v19, %v2767_v22  ;;  %v3253_v19 = vadd.s32 4294967216, %v2767_v22 }
 0x2ee   : > { %v1613_v26 = vsel %vm1612_vm10, %v1611_v23, %v1609_v24  ;;  %v997_v24 = vld [vmem:[%s3944_s9 + $0x1a8] sm:$0xff] }
 0x2ef   : > { %1306 = vadd.xlane.f32.xlu2 %v1137_v25  ;;  %1304 = vadd.xlane.f32.xlu1 %v1136_v29  ;;  %v1013_v29 = vld [vmem:[%s3944_s9 + $0x228] sm:$0xff] }
 0x2f0   : > { %v919_v30 = vpop.f32.mrf.mxu0  ;;  %v939_v31 = vpop.f32.mrf.mxu1  ;;  %1338 = vadd.xlane.f32.xlu0 %v1153_v28 }
 0x2f1   : > { %942 = vst [vmem:[%s2335_s29] sm:$0xff] %v919_v30  ;;  %v996_v30 = vld [vmem:[%s3944_s9 + $0x1a0] sm:$0xff] }
 0x2f2   : > { %943 = vst [vmem:[%s2335_s29 + $0x8] sm:$0xff] %v939_v31  ;;  %v1233_v35 = vpop.xlane.xlu2 %1232  ;;  %v1229_v37 = vpop.xlane.xlu1 %1228  ;;  %v1148_v38 = vmul.f32 %v3115_v62, %v996_v30 }
 0x2f3   : > { %v3185_v44 = vpop.xlane.xlu0 %1254  ;;  %v1615_v46 = vperm.slane %v1229_v37, %v3173_v32  ;;  %v1623_v50 = vperm.slane %v1233_v35, %v3180_v33  ;;  %v1149_v35 = vmul.f32 %v3115_v62, %v997_v24  ;;  %v1165_v37 = vmul.f32 %v3233_v8, %v1013_v29  ;;  %v1005_v29 = vld [vmem:[%s3944_s9 + $0x1e8] sm:$0xff] }
 0x2f4   : > { %v1667_v12 = vperm.slane %v3185_v44, %v3308_v1 }
 0x2f5   : > { %v1617_v49 = vsel %vm1616_vm11, %v1615_v46, %v1613_v26 }
 0x2f6   : > { %v1621_v39 = vsel %vm1620_vm12, %v1619_v45, %v1617_v49  ;;  %v3281_v45 = vadd.s32 4294967208, %v2767_v22 }
 0x2f7   : > { %1312 = vadd.xlane.f32.xlu2 %v1140_v47  ;;  %1310 = vadd.xlane.f32.xlu1 %v1139_v52  ;;  %v1625_v53 = vsel %vm1624_vm13, %v1623_v50, %v1621_v39  ;;  %v1000_v50 = vld [vmem:[%s3944_s9 + $0x1c0] sm:$0xff] }
 0x2f8   : > { %1344 = vadd.xlane.f32.xlu0 %v1156_v34  ;;  %v1016_v39 = vld [vmem:[%s3944_s9 + $0x240] sm:$0xff]  ;;  %v1152_v55 = vmul.f32 %v3115_v62, %v1000_v50 }
 0x2fa   : > { %v1237_v54 = vpop.xlane.xlu2 %1236  ;;  %v1235_v57 = vpop.xlane.xlu1 %1234 }
 0x2fb   : > { %v1631_v56 = vperm.slane %v1237_v54, %v3202_v40  ;;  %v3212_v58 = vpop.xlane.xlu0 %1260  ;;  %v1627_v63 = vperm.slane %v1235_v57, %v3205_v51  ;;  %v1168_v57 = vmul.f32 %v3233_v8, %v1016_v39 }
 0x2fd   : > { %v1629_v2 = vsel %vm1628_vm14, %v1627_v63, %v1625_v53  ;;  %v999_v53 = vld [vmem:[%s3944_s9 + $0x1b8] sm:$0xff] }
 0x2fe   : > { %v1633_v6 = vsel %vm1632_vm15, %v1631_v56, %v1629_v2  ;;  %v1151_v60 = vmul.f32 %v3115_v62, %v999_v53 }
 0x2ff   : > { %1318 = vadd.xlane.f32.xlu2 %v1143_v0  ;;  %1316 = vadd.xlane.f32.xlu1 %v1142_v4  ;;  %v3305_v0 = vadd.s32 4294967192, %v2767_v22 }
 0x300   : > { %1350 = vadd.xlane.f32.xlu0 %v1159_v3  ;;  %v1003_v3 = vld [vmem:[%s3944_s9 + $0x1d8] sm:$0xff] }
 0x301   : > { %v1155_v11 = vmul.f32 %v3115_v62, %v1003_v3 }
 0x302   : > { %v1241_v9 = vpop.xlane.xlu2 %1240  ;;  %v1239_v43 = vpop.xlane.xlu1 %1238 }
 0x303   : > { %v1639_v27 = vperm.slane %v1241_v9, %v3227_v5  ;;  %v3239_v10 = vpop.xlane.xlu0 %1266  ;;  %v1635_v13 = vperm.slane %v1239_v43, %v3231_v7 }
 0x305   : > { %v1637_v16 = vsel %vm1636_vm0, %v1635_v13, %v1633_v6 }
 0x306   : > { %v1641_v20 = vsel %vm1640_vm1, %v1639_v27, %v1637_v16  ;;  %v1002_v27 = vld [vmem:[%s3944_s9 + $0x1d0] sm:$0xff] }
 0x307   : > { %1324 = vadd.xlane.f32.xlu2 %v1146_v14  ;;  %1322 = vadd.xlane.f32.xlu1 %v1145_v18  ;;  %v1171_v14 = vmul.f32 %v3233_v8, %v1019_v59  ;;  %v1154_v16 = vmul.f32 %v3115_v62, %v1002_v27  ;;  %v1012_v59 = vld [vmem:[%s3944_s9 + $0x220] sm:$0xff] }
 0x308   : > { %1356 = vadd.xlane.f32.xlu0 %v1162_v17 }
 0x30a   : > { %v1245_v23 = vpop.xlane.xlu2 %1244  ;;  %v1243_v26 = vpop.xlane.xlu1 %1242 }
 0x30b   : > { %v1647_v25 = vperm.slane %v1245_v23, %v3253_v19  ;;  %v3263_v28 = vpop.xlane.xlu0 %1272  ;;  %v1643_v31 = vperm.slane %v1243_v26, %v3257_v21  ;;  %v1006_v23 = vld [vmem:[%s3944_s9 + $0x1f0] sm:$0xff] }
 0x30c   : > { %v1022_v26 = vld [vmem:[%s3944_s9 + $0x270] sm:$0xff] }
 0x30d   : > { %v1645_v36 = vsel %vm1644_vm2, %v1643_v31, %v1641_v20  ;;  %v1673_v31 = vperm.slane %v3212_v58, %v3173_v32  ;;  %v1009_v58 = vld [vmem:[%s3944_s9 + $0x208] sm:$0xff] }
 0x30e   : > { %v1649_v46 = vsel %vm1648_vm3, %v1647_v25, %v1645_v36  ;;  %v1077_v36 = vrot.slane %v2974_v48, 5 }
 0x30f   : > { %1330 = vadd.xlane.f32.xlu2 %v1149_v35  ;;  %1328 = vadd.xlane.f32.xlu1 %v1148_v38  ;;  %v1158_v35 = vmul.f32 %v3115_v62, %v1006_v23  ;;  %v1174_v38 = vmul.f32 %v3233_v8, %v1022_v26 }
 0x310   : > { %1362 = vadd.xlane.f32.xlu0 %v1165_v37  ;;  %v3354_v50 = vperm.slane %v1077_v36, 0  ;;  %v1014_v36 = vld [vmem:[%s3944_s9 + $0x230] sm:$0xff] }
 0x312   : > { %v1249_v47 = vpop.xlane.xlu2 %1248  ;;  %v1247_v34 = vpop.xlane.xlu1 %1246 }
 0x313   : > { %v1655_v49 = vperm.slane %v1249_v47, %v3277_v42  ;;  %v3287_v52 = vpop.xlane.xlu0 %1278  ;;  %v1651_v54 = vperm.slane %v1247_v34, %v3281_v45 }
 0x315   : > { %v1653_v56 = vsel %vm1652_vm4, %v1651_v54, %v1649_v46  ;;  %v1157_v46 = vmul.f32 %v3115_v62, %v1005_v29  ;;  %v1025_v62 = vld [vmem:[%s3944_s9 + $0x288] sm:$0xff]  ;;  %v1008_v54 = vld [vmem:[%s3944_s9 + $0x200] sm:$0xff]  ;;  %v1015_v29 = vld [vmem:[%s3944_s9 + $0x238] sm:$0xff] }
 0x316   : > { %v1657_v63 = vsel %vm1656_vm5, %v1655_v49, %v1653_v56  ;;  %v1161_v56 = vmul.f32 %v3233_v8, %v1009_v58  ;;  %v1166_v58 = vmul.f32 %v3233_v8, %v1014_v36 }
 0x317   : > { %1336 = vadd.xlane.f32.xlu2 %v1152_v55  ;;  %1334 = vadd.xlane.f32.xlu1 %v1151_v60 }
 0x318   : > { %1368 = vadd.xlane.f32.xlu0 %v1168_v57  ;;  %v1679_v57 = vperm.slane %v3239_v10, %v3205_v51 }
 0x31a   : > { %v1253_v2 = vpop.xlane.xlu2 %1252  ;;  %v1251_v6 = vpop.xlane.xlu1 %1250 }
 0x31b   : > { %v1663_v4 = vperm.slane %v1253_v2, %v3301_v61  ;;  %v3314_v9 = vpop.xlane.xlu0 %1284  ;;  %v1659_v43 = vperm.slane %v1251_v6, %v3305_v0  ;;  %v1160_v2 = vmul.f32 %v3233_v8, %v1008_v54  ;;  %v1018_v54 = vld [vmem:[%s3944_s9 + $0x250] sm:$0xff] }
 0x31d   : > { %v1661_v13 = vsel %vm1660_vm6, %v1659_v43, %v1657_v63  ;;  %v1177_v63 = vmul.f32 %v3354_v50, %v1025_v62 }
 0x31e   : > { %v1665_v17 = vsel %vm1664_vm7, %v1663_v4, %v1661_v13 }
 0x31f   : > { %1342 = vadd.xlane.f32.xlu2 %v1155_v11  ;;  %1340 = vadd.xlane.f32.xlu1 %v1154_v16  ;;  %v3331_v18 = vsel %vm1668_vm8, %v1667_v12, %v1665_v17  ;;  %v1028_v11 = vld [vmem:[%s3944_s9 + $0x2a0] sm:$0xff]  ;;  %v1011_v12 = vld [vmem:[%s3944_s9 + $0x218] sm:$0xff]  ;;  %v1685_v16 = vperm.slane %v3263_v28, %v3227_v5 }
 0x320   : > { %1374 = vadd.xlane.f32.xlu0 %v1171_v14  ;;  %v1164_v14 = vmul.f32 %v3233_v8, %v1012_v59  ;;  %v1163_v23 = vmul.f32 %v3233_v8, %v1011_v12  ;;  %v1021_v12 = vld [vmem:[%s3944_s9 + $0x268] sm:$0xff] }
 0x322   : > { %v1259_v20 = vpop.xlane.xlu2 %1258  ;;  %v1257_v25 = vpop.xlane.xlu1 %1256 }
 0x323   : > { %v3336_v44 = vpop.xlane.xlu0 %1290  ;;  %v1671_v24 = vperm.slane %v1259_v20, %v3154_v15  ;;  %v1670_v30 = vperm.slane %v1257_v25, %v2767_v22  ;;  %v1180_v20 = vmul.f32 %v3354_v50, %v1028_v11 }
 0x325   : > { %v1672_v37 = vsel %vm1612_vm10, %v1671_v24, %v1670_v30 }
 0x326   : > { %v1674_v47 = vsel %vm1616_vm11, %v1673_v31, %v1672_v37 }
 0x327   : > { %1348 = vadd.xlane.f32.xlu2 %v1158_v35  ;;  %1346 = vadd.xlane.f32.xlu1 %v1157_v46  ;;  %v1031_v35 = vld [vmem:[%s3944_s9 + $0x2b8] sm:$0xff]  ;;  %v1691_v46 = vperm.slane %v3287_v52, %v3281_v45 }
 0x328   : > { %1380 = vadd.xlane.f32.xlu0 %v1174_v38  ;;  %v1167_v38 = vmul.f32 %v3233_v8, %v1015_v29 }
 0x32a   : > { %v1265_v49 = vpop.xlane.xlu2 %1264  ;;  %v1263_v53 = vpop.xlane.xlu1 %1262 }
 0x32b   : > { %v3359_v34 = vpop.xlane.xlu0 %1296  ;;  %v1677_v39 = vperm.slane %v1265_v49, %v3180_v33  ;;  %v1675_v55 = vperm.slane %v1263_v53, %v3176_v41  ;;  %v1183_v49 = vmul.f32 %v3354_v50, %v1031_v35 }
 0x32d   : > { %v1676_v60 = vsel %vm1620_vm12, %v1675_v55, %v1674_v47 }
 0x32e   : > { %v1678_v3 = vsel %vm1624_vm13, %v1677_v39, %v1676_v60  ;;  %v1017_v60 = vld [vmem:[%s3944_s9 + $0x248] sm:$0xff] }
 0x32f   : > { %1354 = vadd.xlane.f32.xlu2 %v1161_v56  ;;  %1352 = vadd.xlane.f32.xlu1 %v1160_v2  ;;  %v1680_v4 = vsel %vm1628_vm14, %v1679_v57, %v1678_v3  ;;  %v1034_v57 = vld [vmem:[%s3944_s9 + $0x2d0] sm:$0xff]  ;;  %v1170_v2 = vmul.f32 %v3233_v8, %v1018_v54  ;;  %v1697_v3 = vperm.slane %v3314_v9, %v3301_v61 }
 0x330   : > { %1386 = vadd.xlane.f32.xlu0 %v1177_v63  ;;  %v1169_v59 = vmul.f32 %v3233_v8, %v1017_v60  ;;  %v1702_v9 = vperm.slane %v3336_v44, %v3154_v15  ;;  %v1173_v44 = vmul.f32 %v3233_v8, %v1021_v12 }
 0x332   : > { %v1271_v6 = vpop.xlane.xlu2 %1270  ;;  %v1269_v43 = vpop.xlane.xlu1 %1268 }
 0x333   : > { %v3380_v27 = vpop.xlane.xlu0 %1302  ;;  %v1683_v10 = vperm.slane %v1271_v6, %v3231_v7  ;;  %v1681_v13 = vperm.slane %v1269_v43, %v3202_v40  ;;  %v1186_v6 = vmul.f32 %v3354_v50, %v1034_v57 }
 0x335   : > { %v1682_v17 = vsel %vm1632_vm15, %v1681_v13, %v1680_v4 }
 0x336   : > { %v1684_v24 = vsel %vm1636_vm0, %v1683_v10, %v1682_v17  ;;  %v1037_v17 = vld [vmem:[%s3944_s9 + $0x2e8] sm:$0xff] }
 0x337   : > { %1360 = vadd.xlane.f32.xlu2 %v1164_v14  ;;  %1358 = vadd.xlane.f32.xlu1 %v1163_v23  ;;  %v1686_v25 = vsel %vm1640_vm1, %v1685_v16, %v1684_v24  ;;  %v1189_v29 = vmul.f32 %v3354_v50, %v1037_v17  ;;  %v1030_v17 = vld [vmem:[%s3944_s9 + $0x2b0] sm:$0xff] }
 0x338   : > { %1392 = vadd.xlane.f32.xlu0 %v1180_v20  ;;  %v1020_v20 = vld [vmem:[%s3944_s9 + $0x260] sm:$0xff] }
 0x33a   : > { %v1277_v26 = vpop.xlane.xlu2 %1276  ;;  %v1275_v31 = vpop.xlane.xlu1 %1274 }
 0x33b   : > { %v3401_v30 = vpop.xlane.xlu0 %1308  ;;  %v1689_v28 = vperm.slane %v1277_v26, %v3253_v19  ;;  %v1687_v37 = vperm.slane %v1275_v31, %v3257_v21 }
 0x33d   : > { %v1688_v47 = vsel %vm1644_vm2, %v1687_v37, %v1686_v25  ;;  %v1078_v25 = vrot.slane %v2974_v48, 6  ;;  %v1024_v37 = vld [vmem:[%s3944_s9 + $0x280] sm:$0xff] }
 0x33e   : > { %v1690_v39 = vsel %vm1648_vm3, %v1689_v28, %v1688_v47  ;;  %v1172_v28 = vmul.f32 %v3233_v8, %v1020_v20 }
 0x33f   : > { %1366 = vadd.xlane.f32.xlu2 %v1167_v38  ;;  %1364 = vadd.xlane.f32.xlu1 %v1166_v58  ;;  %v1692_v53 = vsel %vm1652_vm4, %v1691_v46, %v1690_v39  ;;  %v3464_v35 = vperm.slane %v1078_v25, 0  ;;  %v1176_v39 = vmul.f32 %v3354_v50, %v1024_v37 }
 0x340   : > { %1398 = vadd.xlane.f32.xlu0 %v1183_v49  ;;  %v1023_v49 = vld [vmem:[%s3944_s9 + $0x278] sm:$0xff] }
 0x342   : > { %v1283_v62 = vpop.xlane.xlu2 %1282  ;;  %v1281_v56 = vpop.xlane.xlu1 %1280 }
 0x343   : > { %v3422_v55 = vpop.xlane.xlu0 %1314  ;;  %v1695_v52 = vperm.slane %v1283_v62, %v3305_v0  ;;  %v1693_v63 = vperm.slane %v1281_v56, %v3277_v42 }
 0x345   : > { %v1694_v4 = vsel %vm1656_vm5, %v1693_v63, %v1692_v53  ;;  %v1708_v53 = vperm.slane %v3359_v34, %v3180_v33  ;;  %v1027_v63 = vld [vmem:[%s3944_s9 + $0x298] sm:$0xff] }
 0x346   : > { %v1696_v10 = vsel %vm1660_vm6, %v1695_v52, %v1694_v4  ;;  %v1175_v52 = vmul.f32 %v3233_v8, %v1023_v49  ;;  %v1043_v8 = vld [vmem:[%s3944_s9 + $0x318] sm:$0xff]  ;;  %v1026_v4 = vld [vmem:[%s3944_s9 + $0x290] sm:$0xff]  ;;  %v1033_v49 = vld [vmem:[%s3944_s9 + $0x2c8] sm:$0xff] }
 0x347   : > { %1372 = vadd.xlane.f32.xlu2 %v1170_v2  ;;  %1370 = vadd.xlane.f32.xlu1 %v1169_v59  ;;  %v1698_v43 = vsel %vm1664_vm7, %v1697_v3, %v1696_v10  ;;  %v1179_v59 = vmul.f32 %v3354_v50, %v1027_v63  ;;  %v1714_v10 = vperm.slane %v3380_v27, %v3231_v7 }
 0x348   : > { %1404 = vadd.xlane.f32.xlu0 %v1186_v6  ;;  %v1178_v12 = vmul.f32 %v3354_v50, %v1026_v4 }
 0x34a   : > { %v1289_v11 = vpop.xlane.xlu2 %1288  ;;  %v1287_v16 = vpop.xlane.xlu1 %1286 }
 0x34b   : > { %v3445_v13 = vpop.xlane.xlu0 %1320  ;;  %v1701_v14 = vperm.slane %v1289_v11, %v2767_v22  ;;  %v1699_v23 = vperm.slane %v1287_v16, %v3308_v1  ;;  %v1195_v11 = vmul.f32 %v3464_v35, %v1043_v8 }
 0x34d   : > { %v1703_v24 = vsel %vm1612_vm10, %v1702_v9, %v1701_v14  ;;  %v1700_v26 = vsel %vm1668_vm8, %v1699_v23, %v1698_v43 }
 0x34e   : > { %v3462_v31 = vsel %vm1887_vm9, %v1700_v26, %v3331_v18  ;;  %v1040_v18 = vld [vmem:[%s3944_s9 + $0x300] sm:$0xff]  ;;  %v1182_v26 = vmul.f32 %v3354_v50, %v1030_v17  ;;  %vm1889_vm9 = vcmask 1042434  }
 0x34f   : > { %1378 = vadd.xlane.f32.xlu2 %v1173_v44  ;;  %1376 = vadd.xlane.f32.xlu1 %v1172_v28  ;;  %v1192_v54 = vmul.f32 %v3464_v35, %v1040_v18  ;;  %v1029_v44 = vld [vmem:[%s3944_s9 + $0x2a8] sm:$0xff] }
 0x350   : > { %1410 = vadd.xlane.f32.xlu0 %v1189_v29  ;;  %v1720_v29 = vperm.slane %v3401_v30, %v3253_v19  ;;  %v1181_v37 = vmul.f32 %v3354_v50, %v1029_v44  ;;  %v1039_v44 = vld [vmem:[%s3944_s9 + $0x2f8] sm:$0xff] }
 0x352   : > { %v1295_v36 = vpop.xlane.xlu2 %1294  ;;  %v1293_v47 = vpop.xlane.xlu1 %1292 }
 0x353   : > { %v3469_v38 = vpop.xlane.xlu0 %1326  ;;  %v1706_v46 = vperm.slane %v1295_v36, %v3176_v41  ;;  %v1704_v58 = vperm.slane %v1293_v47, %v3173_v32 }
 0x355   : > { %v1705_v62 = vsel %vm1616_vm11, %v1704_v58, %v1703_v24  ;;  %v1046_v24 = vld [vmem:[%s3944_s9 + $0x330] sm:$0xff] }
 0x356   : > { %v1707_v56 = vsel %vm1620_vm12, %v1706_v46, %v1705_v62  ;;  %v1198_v36 = vmul.f32 %v3464_v35, %v1046_v24 }
 0x357   : > { %1384 = vadd.xlane.f32.xlu2 %v1176_v39  ;;  %1382 = vadd.xlane.f32.xlu1 %v1175_v52  ;;  %v1709_v57 = vsel %vm1624_vm13, %v1708_v53, %v1707_v56  ;;  %v1049_v39 = vld [vmem:[%s3944_s9 + $0x348] sm:$0xff]  ;;  %v1032_v53 = vld [vmem:[%s3944_s9 + $0x2c0] sm:$0xff]  ;;  %v1079_v52 = vrot.slane %v2974_v48, 7  ;;  %v1185_v56 = vmul.f32 %v3354_v50, %v1033_v49 }
 0x358   : > { %1416 = vadd.xlane.f32.xlu0 %v1192_v54  ;;  %v1201_v63 = vmul.f32 %v3464_v35, %v1049_v39 }
 0x359   : > { %v3551_v4 = vperm.slane %v1079_v52, 0  ;;  %v1041_v52 = vld [vmem:[%s3944_s9 + $0x308] sm:$0xff] }
 0x35a   : > { %v1301_v60 = vpop.xlane.xlu2 %1300  ;;  %v1299_v3 = vpop.xlane.xlu1 %1298 }
 0x35b   : > { %v3490_v2 = vpop.xlane.xlu0 %1332  ;;  %v1712_v34 = vperm.slane %v1301_v60, %v3202_v40  ;;  %v1710_v6 = vperm.slane %v1299_v3, %v3205_v51 }
 0x35d   : > { %v1711_v43 = vsel %vm1628_vm14, %v1710_v6, %v1709_v57  ;;  %v1726_v57 = vperm.slane %v3422_v55, %v3305_v0  ;;  %v1036_v55 = vld [vmem:[%s3944_s9 + $0x2e0] sm:$0xff] }
 0x35e   : > { %v1713_v9 = vsel %vm1632_vm15, %v1712_v34, %v1711_v43  ;;  %v1184_v34 = vmul.f32 %v3354_v50, %v1032_v53  ;;  %v1035_v43 = vld [vmem:[%s3944_s9 + $0x2d8] sm:$0xff] }
 0x35f   : > { %1390 = vadd.xlane.f32.xlu2 %v1179_v59  ;;  %1388 = vadd.xlane.f32.xlu1 %v1178_v12  ;;  %v1715_v14 = vsel %vm1636_vm0, %v1714_v10, %v1713_v9  ;;  %v1056_v10 = vld [vmem:[%s3944_s9 + $0x380] sm:$0xff]  ;;  %v1188_v12 = vmul.f32 %v3354_v50, %v1036_v55  ;;  %v1187_v17 = vmul.f32 %v3354_v50, %v1035_v43  ;;  %v1065_v43 = vld [vmem:[%s3944_s9 + $0x3c8] sm:$0xff] }
 0x360   : > { %1422 = vadd.xlane.f32.xlu0 %v1195_v11 }
 0x362   : > { %v1307_v16 = vpop.xlane.xlu2 %1306  ;;  %v1305_v23 = vpop.xlane.xlu1 %1304 }
 0x363   : > { %v3511_v20 = vpop.xlane.xlu0 %1338  ;;  %v1718_v27 = vperm.slane %v1307_v16, %v3257_v21  ;;  %v1716_v25 = vperm.slane %v1305_v23, %v3227_v5  ;;  %v1208_v16 = vmul.f32 %v3551_v4, %v1056_v10 }
 0x365   : > { %v1717_v28 = vsel %vm1640_vm1, %v1716_v25, %v1715_v14 }
 0x366   : > { %v1719_v46 = vsel %vm1644_vm2, %v1718_v27, %v1717_v28  ;;  %v1038_v28 = vld [vmem:[%s3944_s9 + $0x2f0] sm:$0xff] }
 0x367   : > { %1396 = vadd.xlane.f32.xlu2 %v1182_v26  ;;  %1394 = vadd.xlane.f32.xlu1 %v1181_v37  ;;  %v1721_v47 = vsel %vm1648_vm3, %v1720_v29, %v1719_v46  ;;  %v1059_v29 = vld [vmem:[%s3944_s9 + $0x398] sm:$0xff]  ;;  %v1191_v37 = vmul.f32 %v3354_v50, %v1039_v44  ;;  %v1737_v46 = vperm.slane %v3469_v38, %v3176_v41  ;;  %v1042_v38 = vld [vmem:[%s3944_s9 + $0x310] sm:$0xff] }
 0x368   : > { %1428 = vadd.xlane.f32.xlu0 %v1198_v36  ;;  %v1190_v49 = vmul.f32 %v3354_v50, %v1038_v28  ;;  %v1062_v50 = vld [vmem:[%s3944_s9 + $0x3b0] sm:$0xff] }
 0x36a   : > { %v1313_v18 = vpop.xlane.xlu2 %1312  ;;  %v1311_v58 = vpop.xlane.xlu1 %1310 }
 0x36b   : > { %v1724_v30 = vperm.slane %v1313_v18, %v3277_v42  ;;  %v3539_v62 = vpop.xlane.xlu0 %1344  ;;  %v1722_v54 = vperm.slane %v1311_v58, %v3281_v45  ;;  %v1211_v18 = vmul.f32 %v3551_v4, %v1059_v29  ;;  %v1048_v29 = vld [vmem:[%s3944_s9 + $0x340] sm:$0xff] }
 0x36d   : > { %v1723_v60 = vsel %vm1652_vm4, %v1722_v54, %v1721_v47 }
 0x36e   : > { %v1725_v3 = vsel %vm1656_vm5, %v1724_v30, %v1723_v60  ;;  %v1743_v60 = vperm.slane %v3490_v2, %v3202_v40  ;;  %v1045_v2 = vld [vmem:[%s3944_s9 + $0x328] sm:$0xff] }
 0x36f   : > { %1402 = vadd.xlane.f32.xlu2 %v1185_v56  ;;  %1400 = vadd.xlane.f32.xlu1 %v1184_v34  ;;  %v1727_v8 = vsel %vm1660_vm6, %v1726_v57, %v1725_v3  ;;  %v1194_v57 = vmul.f32 %v3464_v35, %v1042_v38  ;;  %v1214_v34 = vmul.f32 %v3551_v4, %v1062_v50 }
 0x370   : > { %1434 = vadd.xlane.f32.xlu0 %v1201_v63  ;;  %v1193_v3 = vmul.f32 %v3464_v35, %v1041_v52 }
 0x372   : > { %v1319_v48 = vpop.xlane.xlu2 %1318  ;;  %v1317_v59 = vpop.xlane.xlu1 %1316 }
 0x373   : > { %v1730_v6 = vperm.slane %v1319_v48, %v3308_v1  ;;  %v1728_v11 = vperm.slane %v1317_v59, %v3301_v61  ;;  %v3565_v9 = vpop.xlane.xlu0 %1350 }
 0x375   : > { %v1729_v14 = vsel %vm1664_vm7, %v1728_v11, %v1727_v8  ;;  %v1044_v11 = vld [vmem:[%s3944_s9 + $0x320] sm:$0xff] }
 0x376   : > { %v1731_v27 = vsel %vm1668_vm8, %v1730_v6, %v1729_v14  ;;  %v1197_v14 = vmul.f32 %v3464_v35, %v1045_v2 }
 0x377   : > { %1408 = vadd.xlane.f32.xlu2 %v1188_v12  ;;  %v3572_v23 = vsel %vm1889_vm9, %v1731_v27, %v3462_v31  ;;  %1406 = vadd.xlane.f32.xlu1 %v1187_v17  ;;  %v1732_v31 = vperm.slane %v3445_v13, %v2767_v22  ;;  %v1217_v27 = vmul.f32 %v3551_v4, %v1065_v43  ;;  %vm1891_vm9 = vcmask 1043459  }
 0x378   : > { %1448 = vadd.xlane.f32.xlu0 %v1208_v16  ;;  %v1749_v16 = vperm.slane %v3511_v20, %v3257_v21 }
 0x37a   : > { %v1325_v24 = vpop.xlane.xlu2 %1324  ;;  %v1323_v26 = vpop.xlane.xlu1 %1322 }
 0x37b   : > { %v1735_v25 = vperm.slane %v1325_v24, %v3173_v32  ;;  %v1733_v36 = vperm.slane %v1323_v26, %v3154_v15  ;;  %v3594_v58 = vpop.xlane.xlu0 %1356  ;;  %v1196_v24 = vmul.f32 %v3464_v35, %v1044_v11 }
 0x37d   : > { %v1734_v47 = vsel %vm1612_vm10, %v1733_v36, %v1732_v31  ;;  %v1067_v31 = vld [vmem:[%s3944_s9 + $0x3d8] sm:$0xff] }
 0x37e   : > { %v1736_v30 = vsel %vm1616_vm11, %v1735_v25, %v1734_v47  ;;  %v1047_v36 = vld [vmem:[%s3944_s9 + $0x338] sm:$0xff]  ;;  %v1200_v47 = vmul.f32 %v3464_v35, %v1048_v29 }
 0x37f   : > { %1414 = vadd.xlane.f32.xlu2 %v1191_v37  ;;  %1412 = vadd.xlane.f32.xlu1 %v1190_v49  ;;  %v1738_v13 = vsel %vm1620_vm12, %v1737_v46, %v1736_v30  ;;  %v1219_v30 = vmul.f32 %v3551_v4, %v1067_v31  ;;  %v1060_v31 = vld [vmem:[%s3944_s9 + $0x3a0] sm:$0xff] }
 0x380   : > { %1454 = vadd.xlane.f32.xlu0 %v1211_v18  ;;  %v1755_v18 = vperm.slane %v3539_v62, %v3277_v42  ;;  %v1051_v62 = vld [vmem:[%s3944_s9 + $0x358] sm:$0xff] }
 0x382   : > { %v1331_v39 = vpop.xlane.xlu2 %1330  ;;  %v1329_v54 = vpop.xlane.xlu1 %1328 }
 0x383   : > { %v1741_v53 = vperm.slane %v1331_v39, %v3205_v51  ;;  %v1739_v56 = vperm.slane %v1329_v54, %v3180_v33  ;;  %v3616_v55 = vpop.xlane.xlu0 %1362  ;;  %v1054_v54 = vld [vmem:[%s3944_s9 + $0x370] sm:$0xff] }
 0x385   : > { %v1740_v63 = vsel %vm1624_vm13, %v1739_v56, %v1738_v13  ;;  %v1199_v13 = vmul.f32 %v3464_v35, %v1047_v36  ;;  %v1050_v56 = vld [vmem:[%s3944_s9 + $0x350] sm:$0xff] }
 0x386   : > { %v1742_v8 = vsel %vm1628_vm14, %v1741_v53, %v1740_v63  ;;  %v1203_v63 = vmul.f32 %v3464_v35, %v1051_v62 }
 0x387   : > { %1420 = vadd.xlane.f32.xlu2 %v1194_v57  ;;  %1418 = vadd.xlane.f32.xlu1 %v1193_v3  ;;  %v1744_v48 = vsel %vm1632_vm15, %v1743_v60, %v1742_v8  ;;  %v1206_v60 = vmul.f32 %v3464_v35, %v1054_v54 }
 0x388   : > { %1460 = vadd.xlane.f32.xlu0 %v1214_v34  ;;  %v1761_v34 = vperm.slane %v3565_v9, %v3308_v1  ;;  %v1058_v9 = vld [vmem:[%s3944_s9 + $0x390] sm:$0xff] }
 0x38a   : > { %v1337_v6 = vpop.xlane.xlu2 %1336  ;;  %v1335_v10 = vpop.xlane.xlu1 %1334 }
 0x38b   : > { %v1747_v59 = vperm.slane %v1337_v6, %v3227_v5  ;;  %v1745_v12 = vperm.slane %v1335_v10, %v3231_v7  ;;  %v3647_v37 = vpop.xlane.xlu0 %1368 }
 0x38d   : > { %v1746_v17 = vsel %vm1636_vm0, %v1745_v12, %v1744_v48  ;;  %v1202_v48 = vmul.f32 %v3464_v35, %v1050_v56  ;;  %v1070_v12 = vld [vmem:[%s3944_s9 + $0x3f0] sm:$0xff]  ;;  %v1778_v56 = vperm.slane %v3647_v37, %v3227_v5 }
 0x38e   : > { %v1748_v44 = vsel %vm1640_vm1, %v1747_v59, %v1746_v17  ;;  %v1210_v17 = vmul.f32 %v3551_v4, %v1058_v9  ;;  %v1066_v37 = vld [vmem:[%s3944_s9 + $0x3d0] sm:$0xff] }
 0x38f   : > { %1426 = vadd.xlane.f32.xlu2 %v1197_v14  ;;  %1424 = vadd.xlane.f32.xlu1 %v1196_v24  ;;  %v1750_v25 = vsel %vm1644_vm2, %v1749_v16, %v1748_v44  ;;  %v1057_v14 = vld [vmem:[%s3944_s9 + $0x388] sm:$0xff]  ;;  %v1222_v24 = vmul.f32 %v3551_v4, %v1070_v12 }
 0x390   : > { %1466 = vadd.xlane.f32.xlu0 %v1217_v27  ;;  %v1209_v44 = vmul.f32 %v3551_v4, %v1057_v14  ;;  %v1218_v14 = vmul.f32 %v3551_v4, %v1066_v37 }
 0x392   : > { %v1343_v26 = vpop.xlane.xlu2 %1342  ;;  %v1341_v28 = vpop.xlane.xlu1 %1340 }
 0x393   : > { %v1753_v20 = vperm.slane %v1343_v26, %v3281_v45  ;;  %v1751_v46 = vperm.slane %v1341_v28, %v3253_v19  ;;  %v3673_v3 = vpop.xlane.xlu0 %1374 }
 0x395   : > { %v1752_v49 = vsel %vm1648_vm3, %v1751_v46, %v1750_v25 }
 0x396   : > { %v1754_v39 = vsel %vm1652_vm4, %v1753_v20, %v1752_v49  ;;  %v1212_v49 = vmul.f32 %v3551_v4, %v1060_v31 }
 0x397   : > { %1432 = vadd.xlane.f32.xlu2 %v1200_v47  ;;  %1430 = vadd.xlane.f32.xlu1 %v1199_v13  ;;  %v1756_v38 = vsel %vm1656_vm5, %v1755_v18, %v1754_v39  ;;  %v1772_v47 = vperm.slane %v3616_v55, %v3205_v51  ;;  %v1063_v55 = vld [vmem:[%s3944_s9 + $0x3b8] sm:$0xff] }
 0x398   : > { %1470 = vadd.xlane.f32.xlu0 %v1219_v30 }
 0x39a   : > { %v1349_v53 = vpop.xlane.xlu2 %1348  ;;  %v1347_v52 = vpop.xlane.xlu1 %1346 }
 0x39b   : > { %v1759_v50 = vperm.slane %v1349_v53, %v3301_v61  ;;  %v1757_v57 = vperm.slane %v1347_v52, %v3305_v0  ;;  %v3700_v26 = vpop.xlane.xlu0 %1380  ;;  %v1064_v53 = vld [vmem:[%s3944_s9 + $0x3c0] sm:$0xff] }
 0x39c   : > { %v1216_v52 = vmul.f32 %v3551_v4, %v1064_v53 }
 0x39d   : > { %v1758_v8 = vsel %vm1660_vm6, %v1757_v57, %v1756_v38 }
 0x39e   : > { %v1760_v6 = vsel %vm1664_vm7, %v1759_v50, %v1758_v8 }
 0x39f   : > { %1438 = vadd.xlane.f32.xlu2 %v1203_v63  ;;  %v1762_v2 = vsel %vm1668_vm8, %v1761_v34, %v1760_v6  ;;  %1436 = vadd.xlane.f32.xlu1 %v1202_v48  ;;  %v1052_v48 = vld [vmem:[%s3944_s9 + $0x360] sm:$0xff] }
 0x3a0   : > { %1444 = vadd.xlane.f32.xlu0 %v1206_v60  ;;  %v3680_v59 = vsel %vm1891_vm9, %v1762_v2, %v3572_v23  ;;  %v1766_v23 = vperm.slane %v3594_v58, %v3173_v32  ;;  %v1061_v58 = vld [vmem:[%s3944_s9 + $0x3a8] sm:$0xff]  ;;  %v1215_v60 = vmul.f32 %v3551_v4, %v1063_v55  ;;  %vm1893_vm9 = vcmask 1044484  }
 0x3a1   : > { %v1213_v46 = vmul.f32 %v3551_v4, %v1061_v58  ;;  %v1790_v58 = vperm.slane %v3700_v26, %v3301_v61 }
 0x3a2   : > { %v1355_v10 = vpop.xlane.xlu2 %1354  ;;  %v1353_v11 = vpop.xlane.xlu1 %1352 }
 0x3a3   : > { %v1764_v43 = vperm.slane %v1355_v10, %v3154_v15  ;;  %v1763_v16 = vperm.slane %v1353_v11, %v2767_v22  ;;  %v1387_v39 = vpop.xlane.xlu0 %1386  ;;  %v1784_v11 = vperm.slane %v3673_v3, %v3281_v45  ;;  %v1053_v3 = vld [vmem:[%s3944_s9 + $0x368] sm:$0xff] }
 0x3a4   : > { %v1205_v31 = vmul.f32 %v3464_v35, %v1053_v3  ;;  %v1795_v26 = vperm.slane %v1387_v39, %v3154_v15 }
 0x3a5   : > { %v1765_v27 = vsel %vm1612_vm10, %v1764_v43, %v1763_v16  ;;  %v1204_v43 = vmul.f32 %v3464_v35, %v1052_v48 }
 0x3a6   : > { %v1767_v25 = vsel %vm1616_vm11, %v1766_v23, %v1765_v27  ;;  %v1068_v27 = vld [vmem:[%s3944_s9 + $0x3e0] sm:$0xff] }
 0x3a7   : > { %1452 = vadd.xlane.f32.xlu2 %v1210_v17  ;;  %1450 = vadd.xlane.f32.xlu1 %v1209_v44 }
 0x3a8   : > { %1476 = vadd.xlane.f32.xlu0 %v1222_v24 }
 0x3aa   : > { %v1361_v29 = vpop.xlane.xlu2 %1360  ;;  %v1359_v28 = vpop.xlane.xlu1 %1358 }
 0x3ab   : > { %v1770_v20 = vperm.slane %v1361_v29, %v3180_v33  ;;  %v1768_v36 = vperm.slane %v1359_v28, %v3176_v41  ;;  %v3739_v10 = vpop.xlane.xlu0 %1392  ;;  %v1220_v29 = vmul.f32 %v3551_v4, %v1068_v27 }
 0x3ad   : > { %v1769_v18 = vsel %vm1620_vm12, %v1768_v36, %v1767_v25 }
 0x3ae   : > { %v1771_v30 = vsel %vm1624_vm13, %v1770_v20, %v1769_v18  ;;  %v1055_v18 = vld [vmem:[%s3944_s9 + $0x378] sm:$0xff] }
 0x3af   : > { %1458 = vadd.xlane.f32.xlu2 %v1213_v46  ;;  %1456 = vadd.xlane.f32.xlu1 %v1212_v49  ;;  %v1773_v13 = vsel %vm1628_vm14, %v1772_v47, %v1771_v30 }
 0x3b2   : > { %v1367_v38 = vpop.xlane.xlu2 %1366  ;;  %v1365_v62 = vpop.xlane.xlu1 %1364 }
 0x3b3   : > { %v1776_v54 = vperm.slane %v1367_v38, %v3231_v7  ;;  %v1774_v50 = vperm.slane %v1365_v62, %v3202_v40  ;;  %v3760_v20 = vpop.xlane.xlu0 %1398 }
 0x3b5   : > { %v1775_v57 = vsel %vm1632_vm15, %v1774_v50, %v1773_v13  ;;  %v1069_v13 = vld [vmem:[%s3944_s9 + $0x3e8] sm:$0xff] }
 0x3b6   : > { %v1777_v63 = vsel %vm1636_vm0, %v1776_v54, %v1775_v57  ;;  %v1207_v54 = vmul.f32 %v3464_v35, %v1055_v18  ;;  %v1221_v55 = vmul.f32 %v3551_v4, %v1069_v13 }
 0x3b7   : > { %1464 = vadd.xlane.f32.xlu2 %v1216_v52  ;;  %1462 = vadd.xlane.f32.xlu1 %v1215_v60  ;;  %v1779_v34 = vsel %vm1640_vm1, %v1778_v56, %v1777_v63 }
 0x3ba   : > { %v1373_v8 = vpop.xlane.xlu2 %1372  ;;  %v1371_v2 = vpop.xlane.xlu1 %1370 }
 0x3bb   : > { %v1782_v6 = vperm.slane %v1373_v8, %v3253_v19  ;;  %v1780_v9 = vperm.slane %v1371_v2, %v3257_v21  ;;  %v1405_v50 = vpop.xlane.xlu0 %1404 }
 0x3bd   : > { %v1781_v12 = vsel %vm1644_vm2, %v1780_v9, %v1779_v34 }
 0x3be   : > { %v1783_v16 = vsel %vm1648_vm3, %v1782_v6, %v1781_v12 }
 0x3bf   : > { %1440 = vadd.xlane.f32.xlu2 %v1204_v43  ;;  %1468 = vadd.xlane.f32.xlu1 %v1218_v14  ;;  %v1785_v23 = vsel %vm1652_vm4, %v1784_v11, %v1783_v16 }
 0x3c2   : > { %v1379_v17 = vpop.xlane.xlu2 %1378  ;;  %v1377_v44 = vpop.xlane.xlu1 %1376 }
 0x3c3   : > { %v1788_v24 = vperm.slane %v1379_v17, %v3305_v0  ;;  %v1786_v25 = vperm.slane %v1377_v44, %v3277_v42 }
 0x3c5   : > { %v1787_v28 = vsel %vm1656_vm5, %v1786_v25, %v1785_v23 }
 0x3c6   : > { %v1789_v36 = vsel %vm1660_vm6, %v1788_v24, %v1787_v28 }
 0x3c7   : > { %1472 = vadd.xlane.f32.xlu2 %v1220_v29  ;;  %1442 = vadd.xlane.f32.xlu1 %v1205_v31  ;;  %v1791_v46 = vsel %vm1664_vm7, %v1790_v58, %v1789_v36 }
 0x3ca   : > { %v1385_v47 = vpop.xlane.xlu2 %1384  ;;  %v1383_v30 = vpop.xlane.xlu1 %1382 }
 0x3cb   : > { %v1794_v49 = vperm.slane %v1385_v47, %v2767_v22  ;;  %v1792_v38 = vperm.slane %v1383_v30, %v3308_v1 }
 0x3cd   : > { %v1796_v53 = vsel %vm1612_vm10, %v1795_v26, %v1794_v49  ;;  %v1793_v62 = vsel %vm1668_vm8, %v1792_v38, %v1791_v46 }
 0x3ce   : > { %v3781_v39 = vsel %vm1893_vm9, %v1793_v62, %v3680_v59 }
 0x3cf   : > { %1446 = vadd.xlane.f32.xlu2 %v1207_v54  ;;  %1474 = vadd.xlane.f32.xlu1 %v1221_v55 }
 0x3d2   : > { %v1391_v35 = vpop.xlane.xlu2 %1390 }
 0x3d3   : > { %2139 = shalt.err (!%p2136_p4)
}
 0x3d4   : > { %2054 = dma.vmem_to_hbm [thread:$0]  (%p2313_p5), %s1924_s16, 256, %s1926_s17, %s1905_s19   ;;  %v1799_v59 = vperm.slane %v1391_v35, %v3176_v41  ;;  %v1389_v52 = vpop.xlane.xlu1 %1388  ;;  %v1071_v56 = vld [vmem:[%s3944_s9 + $0x3f8] sm:$0xff]  ;;  %v1801_v60 = vperm.slane %v3739_v10, %v3180_v33  ;;  %v1411_v6 = vpop.xlane.xlu0 %1410  ;;  %v1807_v11 = vperm.slane %v3760_v20, %v3231_v7  ;;  %v1813_v24 = vperm.slane %v1405_v50, %v3253_v19 }
 0x3d5   : > { %v1797_v57 = vperm.slane %v1389_v52, %v3173_v32  ;;  %v1223_v34 = vmul.f32 %v3551_v4, %v1071_v56  ;;  %v1819_v31 = vperm.slane %v1411_v6, %v3305_v0  ;;  %vm1895_vm9 = vcmask 1045509   ;;  %s2050_s18 = sshll.u32 %s2296_s25, 3  ;;  %s1937_s28 = sshll.u32 %s2337_s30, 4  ;;  %s1938_s28 = int_to_ptr.vmem [resolvable:$true] %s1937_s28 }
 0x3d6   : > { %s1935_s19 = scalar_lea.hbm %s3947_s12, %s2050_s18  ;;  %s1910_s23 = scalar_lea.sflag [#allocation6], %s2324_s15 }
 0x3d7   : > { %v1798_v63 = vsel %vm1616_vm11, %v1797_v57, %v1796_v53  ;;  %1478 = vadd.xlane.f32.xlu1 %v1223_v34  ;;  %s1939_s22 = sshll.u32 %s1935_s19, 4  ;;  %s2160_s26 = scalar_lea.hbm %s3947_s12, 48  ;;  %s1940_s22 = int_to_ptr.hbm [resolvable:$true] %s1939_s22 }
 0x3d8   : > { %v1800_v8 = vsel %vm1620_vm12, %v1799_v59, %v1798_v63  ;;  %s2154_s27 = sshra.s32 %s1940_s22, 4  ;;  %s2155_s27 = int_to_ptr.hbm [resolvable:$true] %s2154_s27 }
 0x3d9   : > { %v1802_v48 = vsel %vm1624_vm13, %v1801_v60, %v1800_v8  ;;  %s2156_s14 = scalar_lea.hbm %s2155_s27, 8  ;;  %p2161_p10 = scmp.lt.s32.totalorder %s2155_s27, %s3947_s12 }
 0x3da   : > { %v1397_v2 = vpop.xlane.xlu2 %1396  ;;  %p2157_p7 = scmp.ne.s32.totalorder %s2155_s27, %s2156_s14  ;;  %p2162_p11 = scmp.lt.s32.totalorder %s2160_s26, %s2156_s14 }
 0x3db   : > { %v1805_v37 = vperm.slane %v1397_v2, %v3202_v40 }
 0x3dc   : > { %v1395_v9 = vpop.xlane.xlu1 %1394  ;;  %v1417_v17 = vpop.xlane.xlu0 %1416  ;;  %p2158_p8 = pnand %p2157_p7, %p2313_p5  ;;  %p2163_p12 = por %p2162_p11, %p2161_p10 }
 0x3dd   : > { %v1803_v43 = vperm.slane %v1395_v9, %v3205_v51  ;;  %v1825_v35 = vperm.slane %v1417_v17, %v2767_v22 }
 0x3de   : > { %p2159_p9 = pneg %p2158_p8 }
 0x3df   : > { %v1804_v10 = vsel %vm1628_vm14, %v1803_v43, %v1802_v48 }
 0x3e0   : > { %v1806_v12 = vsel %vm1632_vm15, %v1805_v37, %v1804_v10  ;;  %p2164_p13 = pnand %p2163_p12, %p2159_p9 }
 0x3e1   : > { %v1808_v4 = vsel %vm1636_vm0, %v1807_v11, %v1806_v12 }
 0x3e2   : > { %v1403_v14 = vpop.xlane.xlu2 %1402 }
 0x3e3   : > { %v1811_v16 = vperm.slane %v1403_v14, %v3257_v21 }
 0x3e4   : > { %v1401_v23 = vpop.xlane.xlu1 %1400  ;;  %v1423_v36 = vpop.xlane.xlu0 %1422 }
 0x3e5   : > { %v1809_v27 = vperm.slane %v1401_v23, %v3227_v5  ;;  %v1830_v23 = vperm.slane %v1423_v36, %v3176_v41 }
 0x3e7   : > { %v1810_v44 = vsel %vm1640_vm1, %v1809_v27, %v1808_v4 }
 0x3e8   : > { %v1812_v3 = vsel %vm1644_vm2, %v1811_v16, %v1810_v44 }
 0x3e9   : > { %v1814_v25 = vsel %vm1648_vm3, %v1813_v24, %v1812_v3 }
 0x3ea   : > { %v1409_v29 = vpop.xlane.xlu2 %1408 }
 0x3eb   : > { %v1817_v58 = vperm.slane %v1409_v29, %v3277_v42 }
 0x3ec   : > { %v1407_v20 = vpop.xlane.xlu1 %1406  ;;  %v1429_v54 = vpop.xlane.xlu0 %1428 }
 0x3ed   : > { %v1815_v28 = vperm.slane %v1407_v20, %v3281_v45 }
 0x3ef   : > { %v1816_v46 = vsel %vm1652_vm4, %v1815_v28, %v1814_v25 }
 0x3f0   : > { %v1818_v47 = vsel %vm1656_vm5, %v1817_v58, %v1816_v46 }
 0x3f1   : > { %v1820_v18 = vsel %vm1660_vm6, %v1819_v31, %v1818_v47  ;;  %v1836_v31 = vperm.slane %v1429_v54, %v3202_v40 }
 0x3f2   : > { %v1415_v26 = vpop.xlane.xlu2 %1414 }
 0x3f3   : > { %v1823_v49 = vperm.slane %v1415_v26, %v3308_v1 }
 0x3f4   : > { %v1413_v30 = vpop.xlane.xlu1 %1412  ;;  %v1435_v56 = vpop.xlane.xlu0 %1434 }
 0x3f5   : > { %v1821_v13 = vperm.slane %v1413_v30, %v3301_v61  ;;  %v1842_v54 = vperm.slane %v1435_v56, %v3257_v21 }
 0x3f7   : > { %v1822_v38 = vsel %vm1664_vm7, %v1821_v13, %v1820_v18 }
 0x3f8   : > { %v1824_v53 = vsel %vm1668_vm8, %v1823_v49, %v1822_v38 }
 0x3f9   : > { %v3833_v62 = vsel %vm1895_vm9, %v1824_v53, %v3781_v39 }
 0x3fa   : > { %v1421_v55 = vpop.xlane.xlu2 %1420 }
 0x3fb   : > { %v1828_v10 = vperm.slane %v1421_v55, %v3173_v32 }
 0x3fc   : > { %v1419_v50 = vpop.xlane.xlu1 %1418  ;;  %v1449_v8 = vpop.xlane.xlu0 %1448 }
 0x3fd   : > { %v1826_v59 = vperm.slane %v1419_v50, %v3154_v15  ;;  %v1856_v3 = vperm.slane %v1449_v8, %v2767_v22 }
 0x3ff   : > { %v1827_v52 = vsel %vm1612_vm10, %v1826_v59, %v1825_v35 }
 0x400   : > { %v1829_v12 = vsel %vm1616_vm11, %v1828_v10, %v1827_v52 }
 0x401   : > { %v1831_v44 = vsel %vm1620_vm12, %v1830_v23, %v1829_v12 }
 0x402   : > { %v1427_v57 = vpop.xlane.xlu2 %1426 }
 0x403   : > { %v1834_v24 = vperm.slane %v1427_v57, %v3205_v51 }
 0x404   : > { %v1425_v60 = vpop.xlane.xlu1 %1424  ;;  %v1455_v2 = vpop.xlane.xlu0 %1454 }
 0x405   : > { %v1832_v14 = vperm.slane %v1425_v60, %v3180_v33  ;;  %v1861_v22 = vperm.slane %v1455_v2, %v3176_v41 }
 0x407   : > { %v1833_v25 = vsel %vm1624_vm13, %v1832_v14, %v1831_v44 }
 0x408   : > { %v1835_v20 = vsel %vm1628_vm14, %v1834_v24, %v1833_v25 }
 0x40a   : > { %v1433_v63 = vpop.xlane.xlu2 %1432 }
 0x40b   : > { %v1840_v26 = vperm.slane %v1433_v63, %v3227_v5 }
 0x40c   : > { %v1431_v34 = vpop.xlane.xlu1 %1430  ;;  %v1461_v9 = vpop.xlane.xlu0 %1460 }
 0x40d   : > { %v1838_v28 = vperm.slane %v1431_v34, %v3231_v7  ;;  %v1867_v35 = vperm.slane %v1461_v9, %v3202_v40 }
 0x412   : > { %v1439_v48 = vpop.xlane.xlu2 %1438 }
 0x413   : > { %v1846_v59 = vperm.slane %v1439_v48, %v3281_v45 }
 0x414   : > { %v1437_v6 = vpop.xlane.xlu1 %1436  ;;  %v1467_v4 = vpop.xlane.xlu0 %1466 }
 0x41a   : > { %v1453_v37 = vpop.xlane.xlu2 %1452 }
 0x41b   : > { %v1859_v29 = vperm.slane %v1453_v37, %v3173_v32  ;;  %v1837_v32 = vsel %vm1632_vm15, %v1836_v31, %v1835_v20 }
 0x41c   : > { %v1451_v39 = vpop.xlane.xlu1 %1450  ;;  %v1471_v18 = vpop.xlane.xlu0 %1470  ;;  %v1839_v49 = vsel %vm1636_vm0, %v1838_v28, %v1837_v32 }
 0x41d   : > { %v1857_v27 = vperm.slane %v1451_v39, %v3154_v15  ;;  %v1841_v53 = vsel %vm1640_vm1, %v1840_v26, %v1839_v49 }
 0x41f   : > { %v1858_v58 = vsel %vm1612_vm10, %v1857_v27, %v1856_v3  ;;  %vm1897_vm10 = vcmask 1046534   ;;  %v1480_v3 = vld [vmem:[%s3945_s10] sm:$0xff] }
 0x420   : > { %v1860_v15 = vsel %vm1616_vm11, %v1859_v29, %v1858_v58  ;;  %vm1899_vm11 = vcmask 1047559  }
 0x421   : > { %v1862_v13 = vsel %vm1620_vm12, %v1861_v22, %v1860_v15 }
 0x422   : > { %v1459_v43 = vpop.xlane.xlu2 %1458 }
 0x423   : > { %v1865_v30 = vperm.slane %v1459_v43, %v3205_v51  ;;  %v1843_v51 = vsel %vm1644_vm2, %v1842_v54, %v1841_v53 }
 0x424   : > { %v1457_v11 = vpop.xlane.xlu1 %1456  ;;  %v1445_v8 = vpop.xlane.xlu0 %1444 }
 0x425   : > { %v1863_v46 = vperm.slane %v1457_v11, %v3180_v33  ;;  %v1844_v33 = vperm.slane %v1437_v6, %v3253_v19  ;;  %v1852_v39 = vperm.slane %v1445_v8, %v3301_v61 }
 0x427   : > { %v1864_v38 = vsel %vm1624_vm13, %v1863_v46, %v1862_v13  ;;  %v1845_v57 = vsel %vm1648_vm3, %v1844_v33, %v1843_v51 }
 0x428   : > { %v1866_v41 = vsel %vm1628_vm14, %v1865_v30, %v1864_v38  ;;  %v1847_v40 = vsel %vm1652_vm4, %v1846_v59, %v1845_v57 }
 0x429   : > { %v1868_v56 = vsel %vm1632_vm15, %v1867_v35, %v1866_v41 }
 0x42a   : > { %v1465_v16 = vpop.xlane.xlu2 %1464 }
 0x42b   : > { %v1871_v63 = vperm.slane %v1465_v16, %v3227_v5  ;;  %v1873_v5 = vperm.slane %v1467_v4, %v3257_v21  ;;  %v1877_v21 = vperm.slane %v1471_v18, %v3281_v45 }
 0x42c   : > { %v1463_v17 = vpop.xlane.xlu1 %1462 }
 0x42d   : > { %v1869_v55 = vperm.slane %v1463_v17, %v3231_v7  ;;  %v1477_v17 = vpop.xlane.xlu0 %1476 }
 0x42f   : > { %v1870_v7 = vsel %vm1636_vm0, %v1869_v55, %v1868_v56 }
 0x430   : > { %v1872_v6 = vsel %vm1640_vm1, %v1871_v63, %v1870_v7 }
 0x431   : > { %v1874_v10 = vsel %vm1644_vm2, %v1873_v5, %v1872_v6 }
 0x432   : > { %v1441_v36 = vpop.xlane.xlu2 %1440 }
 0x433   : > { %v1848_v60 = vperm.slane %v1441_v36, %v3277_v42 }
 0x434   : > { %v1469_v47 = vpop.xlane.xlu1 %1468 }
 0x435   : > { %v1849_v48 = vsel %vm1656_vm5, %v1848_v60, %v1847_v40  ;;  %v1875_v2 = vperm.slane %v1469_v47, %v3253_v19 }
 0x437   : > { %v1876_v14 = vsel %vm1648_vm3, %v1875_v2, %v1874_v10 }
 0x438   : > { %v1878_v27 = vsel %vm1652_vm4, %v1877_v21, %v1876_v14 }
 0x43a   : > { %v1473_v50 = vpop.xlane.xlu2 %1472 }
 0x43b   : > { %v1879_v19 = vperm.slane %v1473_v50, %v3277_v42  ;;  %v1883_v42 = vperm.slane %v1477_v17, %v3301_v61 }
 0x43c   : > { %v1443_v52 = vpop.xlane.xlu1 %1442 }
 0x43d   : > { %v1850_v34 = vperm.slane %v1443_v52, %v3305_v0  ;;  %v1880_v24 = vsel %vm1656_vm5, %v1879_v19, %v1878_v27 }
 0x43f   : > { %v1851_v37 = vsel %vm1660_vm6, %v1850_v34, %v1849_v48 }
 0x440   : > { %v1853_v12 = vsel %vm1664_vm7, %v1852_v39, %v1851_v37 }
 0x442   : > { %v1447_v9 = vpop.xlane.xlu2 %1446 }
 0x443   : > { %v1854_v43 = vperm.slane %v1447_v9, %v3308_v1 }
 0x444   : > { %v1475_v11 = vpop.xlane.xlu1 %1474 }
 0x445   : > { %v1855_v16 = vsel %vm1668_vm8, %v1854_v43, %v1853_v12  ;;  %v1881_v4 = vperm.slane %v1475_v11, %v3305_v0 }
 0x446   : > { %v1898_v23 = vsel %vm1897_vm10, %v1855_v16, %v3833_v62 }
 0x447   : > { %v1882_v44 = vsel %vm1660_vm6, %v1881_v4, %v1880_v24 }
 0x448   : > { %v1884_v62 = vsel %vm1664_vm7, %v1883_v42, %v1882_v44 }
 0x44c   : > { %v1479_v45 = vpop.xlane.xlu1 %1478 }
 0x44d   : > { %v1885_v0 = vperm.slane %v1479_v45, %v3308_v1 }
 0x44f   : > { %v1886_v25 = vsel %vm1668_vm8, %v1885_v0, %v1884_v62 }
 0x450   : > { %v1900_v29 = vsel %vm1899_vm11, %v1886_v25, %v1898_v23 }
 0x451   : > { %v1902_v58 = vmul.f32 %v1900_v29, %v1480_v3 }
 0x453   : > { %1903 = vst [vmem:[%s2337_s30] sm:$0xff] %v1902_v58 }
 0x454   : > { %2167 = shalt.err (!%p2164_p13)
}
 0x455   : > { %2055 = dma.vmem_to_hbm [thread:$0]  (%p2313_p5), %s1938_s28, 128, %s1940_s22, %s1910_s23  }
 0x456 PF: > { %s3962_s30 = sld [smem:[#allocation9_spill]]  ;;  %p2065_p0 = scmp.ge.s32.totalorder %s2206_s24, 2 }
 0x458   : > { %p2059_p1 = pnand %p2065_p0, %p2317_p6 }
 0x45a   : > { %p2060_p2 = pneg %p2059_p1 }
 0x45c   : > { %s1951_s17 = sand.u32 1, %s3962_s30  }
 0x45d   : > { %s1952_s19 = scalar_lea.sflag [#allocation4], %s1951_s17 }
 0x45e   : > { %2185 = dma.done.wait (%p2060_p2), %s1952_s19, 256  }
 0x45f   : > { %2187 = vsyncadd (%p2060_p2), %s1952_s19, 4294967040  ;;  %s1962_s25 = scalar_lea.sflag [#allocation6], %s1951_s17 }
 0x460   : > { %2189 = dma.done.wait (%p2060_p2), %s1962_s25, 128  }
 0x461   : > { %2191 = vsyncadd (%p2060_p2), %s1962_s25, 4294967168  ;;  %s3964_s24 = sld [smem:[#allocation12_spill]] }
 0x462   : > { %s3965_s21 = sld [smem:[#allocation10_spill]] }
 0x463   : > { %s3966_s22 = sld [smem:[#allocation11_spill]] }
 0x464   : > { %s3967_s23 = sld [smem:[#allocation13_spill]] }
 0x467   : > { %p26_p5 = scmp.ge.s32.totalorder %s3964_s24, 8  }
 0x469   :  { %28 = sbr.rel (!%p26_p5) target bundleno = 5 (0x5), region = 120 }
 0x46e   :  { %1968 = vsyncpa [#allocation4], 1 }
 0x46f   :  { %1970 = vsyncpa [#allocation4 + $0x1], 1 }
 0x470   :  { %1971 = vsyncpa [#allocation6], 1 }
 0x471   :  { %1973 = vsyncpa [#allocation6 + $0x1], 1 }

</bundles_post_ra>
